<compile_context>
chip_gen: v7x
topology: tpu7x:2x2x1
jax: 0.10.0
libtpu: 0.0.40
codegen_flags: <defaults>
</compile_context>

<pallas_src>
import jax
import jax.numpy as jnp
from jax.experimental import pallas as pl
from jax.experimental.pallas import tpu as pltpu

# Logical (PyTorch) dims.
IN_DIM = 500
HID_DIM = 300
OUT_DIM = 4

# (8,128)-aligned padded dims used by the kernel.
IN_PAD = 512
HID_PAD = 384
OUT_PAD = 128


def dqn_kernel(x_ref, w1_ref, b1_ref, w2_ref, b2_ref, o_ref):
    # fc1: (TB, 512)bf16 @ (512, 384)bf16 -> f32 accumulate, +bias, ReLU
    h = jnp.dot(x_ref[...], w1_ref[...], preferred_element_type=jnp.float32)
    h = jnp.maximum(h + b1_ref[...], 0.0)
    # fc2: (TB, 384)bf16 @ (384, 128)bf16 -> f32 accumulate, +bias, ReLU
    y = jnp.dot(h.astype(jnp.bfloat16), w2_ref[...],
                preferred_element_type=jnp.float32)
    o_ref[...] = jnp.maximum(y + b2_ref[...], 0.0)


def prepare_params(w1_t, b1, w2_t, b2):
    """Zero-pad params to aligned shapes; weights -> bf16, biases stay f32."""
    w1p = jnp.zeros((IN_PAD, HID_PAD), jnp.bfloat16)
    w1p = w1p.at[:IN_DIM, :HID_DIM].set(w1_t.astype(jnp.bfloat16))
    b1p = jnp.zeros((1, HID_PAD), jnp.float32).at[0, :HID_DIM].set(b1)
    w2p = jnp.zeros((HID_PAD, OUT_PAD), jnp.bfloat16)
    w2p = w2p.at[:HID_DIM, :OUT_DIM].set(w2_t.astype(jnp.bfloat16))
    b2p = jnp.zeros((1, OUT_PAD), jnp.float32).at[0, :OUT_DIM].set(b2)
    return w1p, b1p, w2p, b2p


def dqn_forward(state, params, *, tb=256):
    """state: (B, 500) f32. Returns (B, 4) f32.

    tb: batch tile (rows per grid step). 256 matches the v6e/v7x MXU height;
    use 128 on v5e. Weights are fetched once and stay resident across tiles.
    """
    w1p, b1p, w2p, b2p = params
    B = state.shape[0]
    nb = pl.cdiv(B, tb)
    b_pad = nb * tb

    # Zero-pad the activations to (b_pad, 512) and cast to bf16.
    x = jnp.zeros((b_pad, IN_PAD), jnp.bfloat16)
    x = x.at[:B, :IN_DIM].set(state.astype(jnp.bfloat16))

    bytes_accessed = (
        b_pad * IN_PAD * 2            # x (bf16)
        + IN_PAD * HID_PAD * 2        # w1 (bf16)
        + HID_PAD * OUT_PAD * 2       # w2 (bf16)
        + HID_PAD * 4 + OUT_PAD * 4   # biases (f32)
        + b_pad * OUT_PAD * 4         # out (f32)
    )
    cost = pl.CostEstimate(
        flops=2 * b_pad * (IN_PAD * HID_PAD + HID_PAD * OUT_PAD),
        transcendentals=0,
        bytes_accessed=bytes_accessed,
    )

    out = pl.pallas_call(
        dqn_kernel,
        out_shape=jax.ShapeDtypeStruct((b_pad, OUT_PAD), jnp.float32),
        grid=(nb,),
        in_specs=[
            # x streams per batch tile.
            pl.BlockSpec((tb, IN_PAD), lambda i: (i, 0)),
            # Weights/biases: constant index_map -> VMEM-resident across tiles.
            pl.BlockSpec((IN_PAD, HID_PAD), lambda i: (0, 0)),
            pl.BlockSpec((1, HID_PAD), lambda i: (0, 0)),
            pl.BlockSpec((HID_PAD, OUT_PAD), lambda i: (0, 0)),
            pl.BlockSpec((1, OUT_PAD), lambda i: (0, 0)),
        ],
        out_specs=pl.BlockSpec((tb, OUT_PAD), lambda i: (i, 0)),
        compiler_params=pltpu.CompilerParams(
            dimension_semantics=("parallel",),
        ),
        cost_estimate=cost,
    )(x, w1p, b1p, w2p, b2p)

    return out[:B, :OUT_DIM]


def init_params(key):
    """Deterministic init mimicking PyTorch nn.Linear defaults:
    U(-1/sqrt(fan_in), 1/sqrt(fan_in)) for both weight and bias.
    Weights stored pre-transposed as (in, out)."""
    k1, k2, k3, k4 = jax.random.split(key, 4)
    bound1 = 1.0 / (IN_DIM ** 0.5)
    bound2 = 1.0 / (HID_DIM ** 0.5)
    w1_t = jax.random.uniform(k1, (IN_DIM, HID_DIM), jnp.float32, -bound1, bound1)
    b1 = jax.random.uniform(k2, (HID_DIM,), jnp.float32, -bound1, bound1)
    w2_t = jax.random.uniform(k3, (HID_DIM, OUT_DIM), jnp.float32, -bound2, bound2)
    b2 = jax.random.uniform(k4, (OUT_DIM,), jnp.float32, -bound2, bound2)
    return w1_t, b1, w2_t, b2


if __name__ == "__main__":
    key = jax.random.PRNGKey(0)
    k_params, k_state = jax.random.split(key)

    w1_t, b1, w2_t, b2 = init_params(k_params)
    params = prepare_params(w1_t, b1, w2_t, b2)

    B = 2  # small batch (pads to one 256-row tile internally)
    state = jax.random.normal(k_state, (B, IN_DIM), jnp.float32)

    out = jax.block_until_ready(dqn_forward(state, params))

    # Pure-JAX reference with the same bf16 operand rounding, f32 accumulation.
    xb = state.astype(jnp.bfloat16).astype(jnp.float32)
    w1b = w1_t.astype(jnp.bfloat16).astype(jnp.float32)
    w2b = w2_t.astype(jnp.bfloat16).astype(jnp.float32)
    h_ref = jnp.maximum(xb @ w1b + b1, 0.0)
    ref = jnp.maximum(
        h_ref.astype(jnp.bfloat16).astype(jnp.float32) @ w2b + b2, 0.0
    )

    assert out.shape == (B, OUT_DIM)
    assert jnp.allclose(out, ref, atol=2e-2, rtol=2e-2), (out, ref)

    print("KERNEL_OK")
</pallas_src>

<mosaic_0001>
module attributes {stable_mosaic.version = 11 : i64} {
  func.func @dqn_kernel(%arg0: i32, %arg1: memref<256x512xbf16, #tpu.memory_space<vmem>>, %arg2: memref<512x384xbf16, #tpu.memory_space<vmem>>, %arg3: memref<1x384xf32, #tpu.memory_space<vmem>>, %arg4: memref<384x128xbf16, #tpu.memory_space<vmem>>, %arg5: memref<1x128xf32, #tpu.memory_space<vmem>>, %arg6: memref<256x128xf32, #tpu.memory_space<vmem>>) attributes {dimension_semantics = [#tpu.dimension_semantics<parallel>], iteration_bounds = array<i64: 1>, scalar_prefetch = 0 : i64, scratch_operands = 0 : i64, tpu.core_type = #tpu.core_type<tc>, window_params = [{transform_indices = @transform_0, window_bounds = array<i64: 256, 512>}, {pipeline_mode = #tpu.pipeline_mode<synchronous>, transform_indices = @transform_1, window_bounds = array<i64: 512, 384>}, {pipeline_mode = #tpu.pipeline_mode<synchronous>, transform_indices = @transform_2, window_bounds = array<i64: 1, 384>}, {pipeline_mode = #tpu.pipeline_mode<synchronous>, transform_indices = @transform_3, window_bounds = array<i64: 384, 128>}, {pipeline_mode = #tpu.pipeline_mode<synchronous>, transform_indices = @transform_4, window_bounds = array<i64: 1, 128>}, {transform_indices = @transform_5, window_bounds = array<i64: 256, 128>}]} {
    %c0 = arith.constant 0 : index
    %c0_0 = arith.constant 0 : index
    %0 = vector.load %arg1[%c0, %c0_0] : memref<256x512xbf16, #tpu.memory_space<vmem>>, vector<256x512xbf16>
    %c0_1 = arith.constant 0 : index
    %c0_2 = arith.constant 0 : index
    %1 = vector.load %arg2[%c0_1, %c0_2] : memref<512x384xbf16, #tpu.memory_space<vmem>>, vector<512x384xbf16>
    %cst = arith.constant dense<0.000000e+00> : vector<256x384xf32>
    %2 = tpu.matmul %0, %1, %cst {dimension_numbers = #tpu.dot_dimension_numbers<[1], [0], [0], [1], [0, 0, 1, 1], [], []>} : vector<256x512xbf16>, vector<512x384xbf16>, vector<256x384xf32> -> vector<256x384xf32>
    %c0_3 = arith.constant 0 : index
    %c0_4 = arith.constant 0 : index
    %3 = vector.load %arg3[%c0_3, %c0_4] : memref<1x384xf32, #tpu.memory_space<vmem>>, vector<1x384xf32>
    %4 = vector.broadcast %3 : vector<1x384xf32> to vector<256x384xf32>
    %5 = arith.addf %2, %4 : vector<256x384xf32>
    %cst_5 = arith.constant 0.000000e+00 : f32
    %6 = vector.broadcast %cst_5 : f32 to vector<256x384xf32>
    %7 = arith.maximumf %5, %6 : vector<256x384xf32>
    %8 = arith.truncf %7 : vector<256x384xf32> to vector<256x384xbf16>
    %c0_6 = arith.constant 0 : index
    %c0_7 = arith.constant 0 : index
    %9 = vector.load %arg4[%c0_6, %c0_7] : memref<384x128xbf16, #tpu.memory_space<vmem>>, vector<384x128xbf16>
    %cst_8 = arith.constant dense<0.000000e+00> : vector<256x128xf32>
    %10 = tpu.matmul %8, %9, %cst_8 {dimension_numbers = #tpu.dot_dimension_numbers<[1], [0], [0], [1], [0, 0, 1, 1], [], []>} : vector<256x384xbf16>, vector<384x128xbf16>, vector<256x128xf32> -> vector<256x128xf32>
    %c0_9 = arith.constant 0 : index
    %c0_10 = arith.constant 0 : index
    %11 = vector.load %arg5[%c0_9, %c0_10] : memref<1x128xf32, #tpu.memory_space<vmem>>, vector<1x128xf32>
    %12 = vector.broadcast %11 : vector<1x128xf32> to vector<256x128xf32>
    %13 = arith.addf %10, %12 : vector<256x128xf32>
    %cst_11 = arith.constant 0.000000e+00 : f32
    %14 = vector.broadcast %cst_11 : f32 to vector<256x128xf32>
    %15 = arith.maximumf %13, %14 : vector<256x128xf32>
    %c0_12 = arith.constant 0 : index
    %c0_13 = arith.constant 0 : index
    %16 = vector.load %arg6[%c0_12, %c0_13] : memref<256x128xf32, #tpu.memory_space<vmem>>, vector<256x128xf32>
    tpu.vector_store %arg6[%c0_12, %c0_13], %15 {strides = array<i32>} : memref<256x128xf32, #tpu.memory_space<vmem>>, vector<256x128xf32>,
    return
  }
  func.func @transform_0(%arg0: i32) -> (i32, i32) {
    %c0_i32 = arith.constant 0 : i32
    %c0_i32_0 = arith.constant 0 : i32
    return %arg0, %c0_i32 : i32, i32
  }
  func.func @transform_1(%arg0: i32) -> (i32, i32) {
    %c0_i32 = arith.constant 0 : i32
    %c0_i32_0 = arith.constant 0 : i32
    %c0_i32_1 = arith.constant 0 : i32
    return %c0_i32, %c0_i32_0 : i32, i32
  }
  func.func @transform_2(%arg0: i32) -> (i32, i32) {
    %c0_i32 = arith.constant 0 : i32
    %c0_i32_0 = arith.constant 0 : i32
    %c0_i32_1 = arith.constant 0 : i32
    return %c0_i32, %c0_i32_0 : i32, i32
  }
  func.func @transform_3(%arg0: i32) -> (i32, i32) {
    %c0_i32 = arith.constant 0 : i32
    %c0_i32_0 = arith.constant 0 : i32
    %c0_i32_1 = arith.constant 0 : i32
    return %c0_i32, %c0_i32_0 : i32, i32
  }
  func.func @transform_4(%arg0: i32) -> (i32, i32) {
    %c0_i32 = arith.constant 0 : i32
    %c0_i32_0 = arith.constant 0 : i32
    %c0_i32_1 = arith.constant 0 : i32
    return %c0_i32, %c0_i32_0 : i32, i32
  }
  func.func @transform_5(%arg0: i32) -> (i32, i32) {
    %c0_i32 = arith.constant 0 : i32
    %c0_i32_0 = arith.constant 0 : i32
    return %arg0, %c0_i32 : i32, i32
  }
}

</mosaic_0001>

<bundles_post_ra>
// kernel: tpu_custom_call.1
= control target key start
LH: loop header
LB: loop body
LE: loop exit
PB: predicated region body
PF: predicated region fallthrough
CT: control target
= control target key end

     0   :  { %10 = vsyncpa [#allocation3], 0  ;;  %s4102_s0 = inlined_call_operand.hbm [shape: bf16[256,512], index: 0, kind: input, shape index: {}]   ;;  %s4103_s1 = inlined_call_operand.hbm [shape: bf16[512,384], index: 1, kind: input, shape index: {}]   ;;  %s4104_s2 = inlined_call_operand.vmem [shape: f32[1,384], index: 2, kind: input, shape index: {}]   ;;  %s4105_s3 = inlined_call_operand.hbm [shape: bf16[384,128], index: 3, kind: input, shape index: {}]   ;;  %s4106_s4 = inlined_call_operand.vmem [shape: f32[1,128], index: 4, kind: input, shape index: {}]   ;;  %s4107_s5 = inlined_call_operand.hbm [shape: f32[256,128], index: 5, kind: output, shape index: {}]  }
   0x1   :  { %11 = vsyncpa [#allocation6], 0 }
   0x2   :  { %12 = vsyncpa [#allocation4], 0  ;;  %s3634_s18 = smov [#allocation5]   ;;  %s3540_s22 = scalar_lea.hbm %s4103_s1, 12288 }
   0x3   :  { %s30_s19 = sshll.u32 %s3634_s18, 4  ;;  %p3541_p0 = scmp.ne.s32.totalorder %s4103_s1, %s3540_s22  ;;  %s31_s19 = int_to_ptr.vmem [resolvable:$true] %s30_s19 }
   0x4   :  { %p3544_p1 = scmp.lt.u32.totalorder %s3540_s22, %s4103_s1 }
   0x6   :  { %p3546_p2 = pnand %p3544_p1, %p3541_p0 }
   0x8   :  { %3549 = shalt.err (!%p3546_p2)
}
   0x9   :  { %s3550_s27 = scalar_lea.vmem %s31_s19, 12288  ;;  %p3555_p4 = scmp.lt.s32.totalorder %s31_s19, %s31_s19 }
   0xa   :  { %p3551_p3 = scmp.ne.s32.totalorder %s31_s19, %s3550_s27  ;;  %p3556_p5 = scmp.lt.s32.totalorder %s3550_s27, %s3550_s27 }
   0xc   :  { %p3557_p6 = por %p3556_p5, %p3555_p4 }
   0xe   :  { %p3558_p7 = pnand %p3557_p6, %p3551_p3 }
  0x10   :  { %3561 = shalt.err (!%p3558_p7)
}
  0x11   :  { %s3635_s28 = smov 192   ;;  %s3636_s29 = smov 12  }
  0x12   :  { %36 = dma.hbm_to_vmem [thread:$0]  %s4103_s1, 12288, %s31_s19, [#allocation6], %s3635_s28, %s3635_s28, %s3636_s29  }
  0x13   :  { %s3637_s7 = smov [#allocation2]   ;;  %s3562_s11 = scalar_lea.hbm %s4102_s0, 8192 }
  0x14   :  { %s18_s8 = sshll.u32 %s3637_s7, 4  ;;  %p3563_p8 = scmp.ne.s32.totalorder %s4102_s0, %s3562_s11  ;;  %s19_s8 = int_to_ptr.vmem [resolvable:$true] %s18_s8 }
  0x15   :  { %p3566_p9 = scmp.lt.u32.totalorder %s3562_s11, %s4102_s0 }
  0x17   :  { %p3568_p10 = pnand %p3566_p9, %p3563_p8 }
  0x19   :  { %3571 = shalt.err (!%p3568_p10)
}
  0x1a   :  { %s3572_s16 = scalar_lea.vmem %s19_s8, 8192  ;;  %p3577_p12 = scmp.lt.s32.totalorder %s19_s8, %s19_s8 }
  0x1b   :  { %p3573_p11 = scmp.ne.s32.totalorder %s19_s8, %s3572_s16  ;;  %p3578_p13 = scmp.lt.s32.totalorder %s3572_s16, %s3572_s16 }
  0x1d   :  { %p3579_p0 = por %p3578_p13, %p3577_p12 }
  0x1f   :  { %p3580_p1 = pnand %p3579_p0, %p3573_p11 }
  0x21   :  { %3583 = shalt.err (!%p3580_p1)
}
  0x22   :  { %s3638_s1 = smov 256   ;;  %s3639_s17 = smov 16  }
  0x23   :  { %24 = dma.hbm_to_vmem [thread:$0]  %s4102_s0, 8192, %s19_s8, [#allocation3], %s3638_s1, %s3638_s1, %s3639_s17  }
  0x24   :  { %s3640_s20 = smov [#allocation7]   ;;  %s3584_s24 = scalar_lea.hbm %s4105_s3, 3072 }
  0x25   :  { %s44_s21 = sshll.u32 %s3640_s20, 4  ;;  %p3585_p2 = scmp.ne.s32.totalorder %s4105_s3, %s3584_s24  ;;  %s45_s21 = int_to_ptr.vmem [resolvable:$true] %s44_s21 }
  0x26   :  { %p3588_p3 = scmp.lt.u32.totalorder %s3584_s24, %s4105_s3 }
  0x28   :  { %p3590_p4 = pnand %p3588_p3, %p3585_p2 }
  0x2a   :  { %3593 = shalt.err (!%p3590_p4)
}
  0x2b   :  { %s3594_s29 = scalar_lea.vmem %s45_s21, 3072  ;;  %p3599_p6 = scmp.lt.s32.totalorder %s45_s21, %s45_s21 }
  0x2c   :  { %p3595_p5 = scmp.ne.s32.totalorder %s45_s21, %s3594_s29  ;;  %p3600_p7 = scmp.lt.s32.totalorder %s3594_s29, %s3594_s29 }
  0x2e   :  { %p3601_p8 = por %p3600_p7, %p3599_p6 }
  0x30   :  { %p3602_p9 = pnand %p3601_p8, %p3595_p5 }
  0x32   :  { %3605 = shalt.err (!%p3602_p9)
}
  0x33   :  { %s3641_s0 = smov 64   ;;  %s3642_s30 = smov 4  }
  0x34   :  { %50 = dma.hbm_to_vmem [thread:$0]  %s4105_s3, 3072, %s45_s21, [#allocation6], %s3641_s0, %s3641_s0, %s3642_s30  }
  0x35   :  { %3628 = dma.done.wait [#allocation3], 8192  }
  0x36   :  { %3629 = vsyncadd [#allocation3], 4294959104 }
  0x37   :  { %3630 = dma.done.wait [#allocation6], 15360  }
  0x38   :  { %3631 = vsyncadd [#allocation6], 4294951936  ;;  %v3292_v0 = vld [vmem:[#allocation5 + $0x4] ss:$12 sps:$4 sm:$0xff]   ;;  %v3294_v1 = vld [vmem:[#allocation5 + $0xc8] ss:$12 sps:$4 sm:$0xff]  }
  0x39   :  { %1104 = vmatprep.subr.bf16.mxu0 %v3292_v0  ;;  %v3295_v2 = vld [vmem:[#allocation5] ss:$12 sps:$4 sm:$0xff]   ;;  %2744 = vmatprep.subr.bf16.mxu1 %v3294_v1  ;;  %v3296_v3 = vld [vmem:[#allocation5 + $0x8] ss:$12 sps:$4 sm:$0xff]   ;;  %v3300_v6 = vld [vmem:[#allocation5 + $0x18] ss:$12 sps:$4 sm:$0xff]  }
  0x3a   :  { %1105 = vmatpush1.bf16.msra.mxu0 %v3295_v2  ;;  %v3297_v4 = vld [vmem:[#allocation5 + $0x1c] ss:$12 sps:$4 sm:$0xff]   ;;  %2745 = vmatpush3.bf16.msra.mxu1 %v3296_v3  ;;  %v3299_v5 = vld [vmem:[#allocation5 + $0xe0] ss:$12 sps:$4 sm:$0xff]   ;;  %v3304_v9 = vld [vmem:[#allocation5 + $0xf8] ss:$12 sps:$4 sm:$0xff]  }
  0x3b   :  { %1106 = vmatprep.subr.bf16.mxu0 %v3297_v4  ;;  %v3301_v7 = vld [vmem:[#allocation5 + $0x20] ss:$12 sps:$4 sm:$0xff]   ;;  %2746 = vmatprep.subr.bf16.mxu1 %v3299_v5  ;;  %v3305_v10 = vld [vmem:[#allocation5 + $0x30] ss:$12 sps:$4 sm:$0xff]   ;;  %v3306_v11 = vld [vmem:[#allocation5 + $0x38] ss:$12 sps:$4 sm:$0xff]  }
  0x3c   :  { %v3302_v8 = vld [vmem:[#allocation5 + $0x34] ss:$12 sps:$4 sm:$0xff]   ;;  %v3307_v12 = vld [vmem:[#allocation5 + $0x4c] ss:$12 sps:$4 sm:$0xff]   ;;  %v3309_v13 = vld [vmem:[#allocation5 + $0x110] ss:$12 sps:$4 sm:$0xff]  }
  0x3d   :  { %v3310_v14 = vld [vmem:[#allocation5 + $0x48] ss:$12 sps:$4 sm:$0xff]   ;;  %v3311_v15 = vld [vmem:[#allocation5 + $0x50] ss:$12 sps:$4 sm:$0xff]   ;;  %v3315_v18 = vld [vmem:[#allocation5 + $0x60] ss:$12 sps:$4 sm:$0xff]  }
  0x3e   :  { %1107 = vmatpush1.bf16.msra.mxu0 %v3300_v6  ;;  %2747 = vmatpush3.bf16.msra.mxu1 %v3301_v7  ;;  %v3312_v16 = vld [vmem:[#allocation5 + $0x64] ss:$12 sps:$4 sm:$0xff]   ;;  %v3314_v17 = vld [vmem:[#allocation5 + $0x128] ss:$12 sps:$4 sm:$0xff]   ;;  %v3319_v21 = vld [vmem:[#allocation5 + $0x140] ss:$12 sps:$4 sm:$0xff]  }
  0x3f   :  { %1108 = vmatprep.subr.bf16.mxu0 %v3302_v8  ;;  %2748 = vmatprep.subr.bf16.mxu1 %v3304_v9  ;;  %v3316_v19 = vld [vmem:[#allocation5 + $0x68] ss:$12 sps:$4 sm:$0xff]   ;;  %v3320_v22 = vld [vmem:[#allocation5 + $0x78] ss:$12 sps:$4 sm:$0xff]   ;;  %v3321_v23 = vld [vmem:[#allocation5 + $0x80] ss:$12 sps:$4 sm:$0xff]  }
  0x40   :  { %v3317_v20 = vld [vmem:[#allocation5 + $0x7c] ss:$12 sps:$4 sm:$0xff]   ;;  %v3322_v24 = vld [vmem:[#allocation5 + $0x94] ss:$12 sps:$4 sm:$0xff]   ;;  %v3324_v25 = vld [vmem:[#allocation5 + $0x158] ss:$12 sps:$4 sm:$0xff]  }
  0x41   :  { %v3325_v26 = vld [vmem:[#allocation5 + $0x90] ss:$12 sps:$4 sm:$0xff]   ;;  %v3326_v27 = vld [vmem:[#allocation5 + $0x98] ss:$12 sps:$4 sm:$0xff]   ;;  %v3330_v30 = vld [vmem:[#allocation5 + $0xa8] ss:$12 sps:$4 sm:$0xff]  }
  0x42   :  { %1109 = vmatpush1.bf16.msra.mxu0 %v3305_v10  ;;  %2749 = vmatpush3.bf16.msra.mxu1 %v3306_v11  ;;  %v3327_v28 = vld [vmem:[#allocation5 + $0xac] ss:$12 sps:$4 sm:$0xff]   ;;  %v3329_v29 = vld [vmem:[#allocation5 + $0x170] ss:$12 sps:$4 sm:$0xff]   ;;  %v3334_v31 = vld [vmem:[#allocation2 + $0x4] ss:$16 sps:$4 sm:$0xff]  }
  0x43   :  { %1110 = vmatprep.subr.bf16.mxu0 %v3307_v12  ;;  %2750 = vmatprep.subr.bf16.mxu1 %v3309_v13  ;;  %v3331_v32 = vld [vmem:[#allocation5 + $0xb0] ss:$12 sps:$4 sm:$0xff]   ;;  %v3337_v35 = vld [vmem:[#allocation5 + $0xc0] ss:$12 sps:$4 sm:$0xff]   ;;  %v3714_v37 = vld [vmem:[#allocation2 + $0x24] ss:$16 sps:$4 sm:$0xff]  }
  0x44   :  { %v3335_v33 = vld [vmem:[#allocation5 + $0xc4] ss:$12 sps:$4 sm:$0xff]   ;;  %1522 = vmatprep.mubr.bf16.mxu1 %v3334_v31  ;;  %1136 = vmatprep.mubr.bf16.mxu0 %v3334_v31  ;;  %v3338_v36 = vld [vmem:[#allocation5 + $0xdc] ss:$12 sps:$4 sm:$0xff]   ;;  %v3343_v39 = vld [vmem:[#allocation5 + $0xf4] ss:$12 sps:$4 sm:$0xff]  }
  0x45   :  { %v3712_v34 = vld [vmem:[#allocation2] ss:$16 sps:$4 sm:$0xff]   ;;  %v3340_v38 = vld [vmem:[#allocation5 + $0xd8] ss:$12 sps:$4 sm:$0xff]   ;;  %v3349_v44 = vld [vmem:[#allocation5 + $0x108] ss:$12 sps:$4 sm:$0xff]  }
  0x46   :  { %1111 = vmatpush1.bf16.msra.mxu0 %v3310_v14  ;;  %2751 = vmatpush3.bf16.msra.mxu1 %v3311_v15  ;;  %v3718_v40 = vld [vmem:[#allocation2 + $0x20] ss:$16 sps:$4 sm:$0xff]   ;;  %v3347_v42 = vld [vmem:[#allocation5 + $0x10c] ss:$12 sps:$4 sm:$0xff]   ;;  %v3720_v43 = vld [vmem:[#allocation2 + $0x44] ss:$16 sps:$4 sm:$0xff]  }
  0x47   :  { %1112 = vmatprep.subr.bf16.mxu0 %v3312_v16  ;;  %2752 = vmatprep.subr.bf16.mxu1 %v3314_v17  ;;  %v3346_v41 = vld [vmem:[#allocation5 + $0xf0] ss:$12 sps:$4 sm:$0xff]   ;;  %v3374_v47 = vld [vmem:[#allocation5 + $0x248] ss:$12 sps:$4 sm:$0xff]   ;;  %v3355_v49 = vld [vmem:[#allocation5 + $0x120] ss:$12 sps:$4 sm:$0xff]  }
  0x48   :  { %v3352_v45 = vld [vmem:[#allocation5 + $0x124] ss:$12 sps:$4 sm:$0xff]   ;;  %v3375_v48 = vld [vmem:[#allocation5 + $0x188] ss:$12 sps:$4 sm:$0xff]   ;;  %v3388_v54 = vld [vmem:[#allocation5 + $0x260] ss:$12 sps:$4 sm:$0xff]  }
  0x49   :  { %v3724_v46 = vld [vmem:[#allocation2 + $0x40] ss:$16 sps:$4 sm:$0xff]   ;;  %v3356_v50 = vld [vmem:[#allocation5 + $0x13c] ss:$12 sps:$4 sm:$0xff]   ;;  %v3726_v51 = vld [vmem:[#allocation2 + $0x64] ss:$16 sps:$4 sm:$0xff]  }
  0x4a   :  { %1113 = vmatpush1.bf16.msra.mxu0 %v3315_v18  ;;  %2753 = vmatpush3.bf16.msra.mxu1 %v3316_v19  ;;  %v3358_v52 = vld [vmem:[#allocation5 + $0x138] ss:$12 sps:$4 sm:$0xff]   ;;  %v3361_v53 = vld [vmem:[#allocation5 + $0x154] ss:$12 sps:$4 sm:$0xff]   ;;  %v3364_v57 = vld [vmem:[#allocation5 + $0x150] ss:$12 sps:$4 sm:$0xff]  }
  0x4b   :  { %1114 = vmatprep.subr.bf16.mxu0 %v3317_v20  ;;  %2754 = vmatprep.subr.bf16.mxu1 %v3319_v21  ;;  %v3389_v55 = vld [vmem:[#allocation5 + $0x1a0] ss:$12 sps:$4 sm:$0xff]   ;;  %v3732_v59 = vld [vmem:[#allocation2 + $0x84] ss:$16 sps:$4 sm:$0xff]   ;;  %v3380_v4 = vld [vmem:[#allocation5 + $0x19c] ss:$12 sps:$4 sm:$0xff]  }
  0x4c   :  { %v3730_v56 = vld [vmem:[#allocation2 + $0x60] ss:$16 sps:$4 sm:$0xff]   ;;  %v3365_v58 = vld [vmem:[#allocation5 + $0x16c] ss:$12 sps:$4 sm:$0xff]   ;;  %v3367_v60 = vld [vmem:[#allocation5 + $0x168] ss:$12 sps:$4 sm:$0xff]  }
  0x4d   :  { %v3372_v61 = vld [vmem:[#allocation5 + $0x184] ss:$12 sps:$4 sm:$0xff]   ;;  %v3370_v0 = vld [vmem:[#allocation5 + $0x180] ss:$12 sps:$4 sm:$0xff]   ;;  %v3430_v12 = vld [vmem:[#allocation5 + $0x2a8] ss:$12 sps:$4 sm:$0xff]  }
  0x4e   :  { %1115 = vmatpush1.bf16.msra.mxu0 %v3320_v22  ;;  %2755 = vmatpush3.bf16.msra.mxu1 %v3321_v23  ;;  %v3402_v62 = vld [vmem:[#allocation5 + $0x278] ss:$12 sps:$4 sm:$0xff]   ;;  %v3736_v1 = vld [vmem:[#allocation2 + $0x80] ss:$16 sps:$4 sm:$0xff]   ;;  %v3431_v13 = vld [vmem:[#allocation5 + $0x1e8] ss:$12 sps:$4 sm:$0xff]  }
  0x4f   :  { %1116 = vmatprep.subr.bf16.mxu0 %v3322_v24  ;;  %2756 = vmatprep.subr.bf16.mxu1 %v3324_v25  ;;  %v3403_v63 = vld [vmem:[#allocation5 + $0x1b8] ss:$12 sps:$4 sm:$0xff]   ;;  %v3386_v5 = vld [vmem:[#allocation5 + $0x1b4] ss:$12 sps:$4 sm:$0xff]   ;;  %v3416_v6 = vld [vmem:[#allocation5 + $0x290] ss:$12 sps:$4 sm:$0xff]  }
  0x50   :  { %v3738_v2 = vld [vmem:[#allocation2 + $0xa4] ss:$16 sps:$4 sm:$0xff]   ;;  %v3417_v7 = vld [vmem:[#allocation5 + $0x1d0] ss:$12 sps:$4 sm:$0xff]   ;;  %v3394_v11 = vld [vmem:[#allocation5 + $0x1cc] ss:$12 sps:$4 sm:$0xff]  }
  0x51   :  { %v3378_v3 = vld [vmem:[#allocation5 + $0x198] ss:$12 sps:$4 sm:$0xff]   ;;  %v3744_v8 = vld [vmem:[#allocation2 + $0xa0] ss:$16 sps:$4 sm:$0xff]   ;;  %v3392_v14 = vld [vmem:[#allocation5 + $0x1c8] ss:$12 sps:$4 sm:$0xff]  }
  0x52   :  { %1117 = vmatpush1.bf16.msra.mxu0 %v3325_v26  ;;  %2757 = vmatpush3.bf16.msra.mxu1 %v3326_v27  ;;  %v3746_v9 = vld [vmem:[#allocation2 + $0xc4] ss:$16 sps:$4 sm:$0xff]   ;;  %v3384_v10 = vld [vmem:[#allocation5 + $0x1b0] ss:$12 sps:$4 sm:$0xff]   ;;  %v3398_v18 = vld [vmem:[#allocation5 + $0x1e0] ss:$12 sps:$4 sm:$0xff]  }
  0x53   :  { %1118 = vmatprep.subr.bf16.mxu0 %v3327_v28  ;;  %2758 = vmatprep.subr.bf16.mxu1 %v3329_v29  ;;  %v3400_v15 = vld [vmem:[#allocation5 + $0x1e4] ss:$12 sps:$4 sm:$0xff]   ;;  %v3408_v19 = vld [vmem:[#allocation5 + $0x1fc] ss:$12 sps:$4 sm:$0xff]   ;;  %v3444_v20 = vld [vmem:[#allocation5 + $0x2c0] ss:$12 sps:$4 sm:$0xff]  }
  0x54   :  { %v3752_v16 = vld [vmem:[#allocation2 + $0xc0] ss:$16 sps:$4 sm:$0xff]   ;;  %v3754_v17 = vld [vmem:[#allocation2 + $0xe4] ss:$16 sps:$4 sm:$0xff]   ;;  %v3422_v29 = vld [vmem:[#allocation5 + $0x22c] ss:$12 sps:$4 sm:$0xff]  }
  0x55   :  { %v3445_v21 = vld [vmem:[#allocation5 + $0x200] ss:$12 sps:$4 sm:$0xff]   ;;  %v3406_v22 = vld [vmem:[#allocation5 + $0x1f8] ss:$12 sps:$4 sm:$0xff]   ;;  %v3412_v26 = vld [vmem:[#allocation5 + $0x210] ss:$12 sps:$4 sm:$0xff]  }
  0x56   :  { %1119 = vmatpush1.bf16.msra.mxu0 %v3330_v30  ;;  %2759 = vmatpush3.bf16.msra.mxu1 %v3331_v32  ;;  %v3760_v23 = vld [vmem:[#allocation2 + $0xe0] ss:$16 sps:$4 sm:$0xff]   ;;  %v3762_v25 = vld [vmem:[#allocation2 + $0x104] ss:$16 sps:$4 sm:$0xff]  }
  0x57   :  { %1120 = vmatprep.subr.bf16.mxu0 %v3335_v33  ;;  %2856 = vmatprep.subr.bf16.mxu1 %v3374_v47  ;;  %v3414_v24 = vld [vmem:[#allocation5 + $0x214] ss:$12 sps:$4 sm:$0xff]   ;;  %v3452_v27 = vld [vmem:[#allocation5 + $0x2d8] ss:$12 sps:$4 sm:$0xff]   ;;  %v3454_v30 = vld [vmem:[#allocation5 + $0x2f0] ss:$12 sps:$4 sm:$0xff]  }
  0x58   :  { %v3453_v28 = vld [vmem:[#allocation5 + $0x218] ss:$12 sps:$4 sm:$0xff]   ;;  %v3455_v31 = vld [vmem:[#allocation5 + $0x230] ss:$12 sps:$4 sm:$0xff]   ;;  %v3420_v32 = vld [vmem:[#allocation5 + $0x228] ss:$12 sps:$4 sm:$0xff]  }
  0x59   :  { %1523 = vmatmul.mubr.bf16.vlgmr.msra.gmra.mrb[0].mxu1 %v3712_v34  ;;  %v3428_v33 = vld [vmem:[#allocation5 + $0x244] ss:$12 sps:$4 sm:$0xff]  }
  0x5a   :  { %1121 = vmatpush1.bf16.msra.mxu0 %v3337_v35  ;;  %1530 = vmatprep.mubr.bf16.mxu1 %v3714_v37  ;;  %v3404_v35 = vld [vmem:[#allocation2 + $0x124] ss:$16 sps:$4 sm:$0xff]  }
  0x5b   :  { %1122 = vmatprep.subr.bf16.mxu0 %v3338_v36  ;;  %2857 = vmatpush3.bf16.msra.mxu1 %v3375_v48  ;;  %v3426_v36 = vld [vmem:[#allocation5 + $0x240] ss:$12 sps:$4 sm:$0xff]   ;;  %v3418_v47 = vld [vmem:[#allocation2 + $0x164] ss:$16 sps:$4 sm:$0xff]  }
  0x5c   :  { %2858 = vmatprep.subr.bf16.mxu1 %v3388_v54  ;;  %v3459_v48 = vld [vmem:[#allocation5 + $0x2a0] ss:$12 sps:$4 sm:$0xff]   ;;  %v3470_v54 = vld [vmem:[#allocation5 + $0x2d0] ss:$12 sps:$4 sm:$0xff]  }
  0x5e   :  { %1123 = vmatpush1.bf16.msra.mxu0 %v3340_v38  ;;  %v3434_v38 = vld [vmem:[#allocation5 + $0x258] ss:$12 sps:$4 sm:$0xff]  }
  0x5f   :  { %1124 = vmatprep.subr.bf16.mxu0 %v3343_v39  ;;  %2859 = vmatpush3.bf16.msra.mxu1 %v3389_v55  ;;  %v3442_v39 = vld [vmem:[#allocation5 + $0x274] ss:$12 sps:$4 sm:$0xff]   ;;  %v3478_v55 = vld [vmem:[#allocation5 + $0x2ec] ss:$12 sps:$4 sm:$0xff]  }
  0x60   :  { %2860 = vmatprep.subr.bf16.mxu1 %v3402_v62  ;;  %v3446_v62 = vld [vmem:[#allocation2 + $0x1e4] ss:$16 sps:$4 sm:$0xff]  }
  0x61   :  { %1531 = vmatmul.mubr.bf16.gmra.mrb[4].mxu1 %v3718_v40 }
  0x62   :  { %1125 = vmatpush1.bf16.msra.mxu0 %v3346_v41  ;;  %1538 = vmatprep.mubr.bf16.mxu1 %v3720_v43  ;;  %v3410_v41 = vld [vmem:[#allocation2 + $0x144] ss:$16 sps:$4 sm:$0xff]  }
  0x63   :  { %1126 = vmatprep.subr.bf16.mxu0 %v3347_v42  ;;  %2861 = vmatpush3.bf16.msra.mxu1 %v3403_v63  ;;  %v3440_v42 = vld [vmem:[#allocation5 + $0x270] ss:$12 sps:$4 sm:$0xff]  }
  0x64   :  { %2862 = vmatprep.subr.bf16.mxu1 %v3416_v6  ;;  %v3451_v63 = vld [vmem:[#allocation2 + $0x1e0] ss:$16 sps:$4 sm:$0xff]   ;;  %v3468_v6 = vld [vmem:[#allocation2 + $0x4c] ss:$16 sps:$4 sm:$0xff]  }
  0x66   :  { %1127 = vmatpush1.bf16.msra.mxu0 %v3349_v44  ;;  %v3448_v44 = vld [vmem:[#allocation5 + $0x288] ss:$12 sps:$4 sm:$0xff]  }
  0x67   :  { %1128 = vmatprep.subr.bf16.mxu0 %v3352_v45  ;;  %2863 = vmatpush3.bf16.msra.mxu1 %v3417_v7  ;;  %v3415_v45 = vld [vmem:[#allocation2 + $0x140] ss:$16 sps:$4 sm:$0xff]   ;;  %v3518_v7 = vld [vmem:[#allocation7 + $0x48] sm:$0xff]  }
  0x68   :  { %2864 = vmatprep.subr.bf16.mxu1 %v3430_v12  ;;  %v3480_v12 = vld [vmem:[#allocation2 + $0x8c] ss:$16 sps:$4 sm:$0xff]  }
  0x69   :  { %1539 = vmatmul.mubr.bf16.gmra.mrb[8].mxu1 %v3724_v46 }
  0x6a   :  { %1129 = vmatpush1.bf16.msra.mxu0 %v3355_v49  ;;  %1546 = vmatprep.mubr.bf16.mxu1 %v3726_v51  ;;  %v3466_v49 = vld [vmem:[#allocation5 + $0x2bc] ss:$12 sps:$4 sm:$0xff]  }
  0x6b   :  { %1130 = vmatprep.subr.bf16.mxu0 %v3356_v50  ;;  %2865 = vmatpush3.bf16.msra.mxu1 %v3431_v13  ;;  %v3464_v50 = vld [vmem:[#allocation5 + $0x2b8] ss:$12 sps:$4 sm:$0xff]   ;;  %v3520_v13 = vld [vmem:[#allocation7 + $0x50] sm:$0xff]  }
  0x6c   :  { %2866 = vmatprep.subr.bf16.mxu1 %v3444_v20  ;;  %v3486_v20 = vld [vmem:[#allocation2 + $0xcc] ss:$16 sps:$4 sm:$0xff]  }
  0x6e   :  { %1131 = vmatpush1.bf16.msra.mxu0 %v3358_v52  ;;  %v3423_v52 = vld [vmem:[#allocation2 + $0x160] ss:$16 sps:$4 sm:$0xff]  }
  0x6f   :  { %1132 = vmatprep.subr.bf16.mxu0 %v3361_v53  ;;  %2867 = vmatpush3.bf16.msra.mxu1 %v3445_v21  ;;  %v3424_v53 = vld [vmem:[#allocation2 + $0x184] ss:$16 sps:$4 sm:$0xff]  }
  0x70   :  { %2868 = vmatprep.subr.bf16.mxu1 %v3452_v27  ;;  %v3524_v21 = vld [vmem:[#allocation7 + $0x60] sm:$0xff]   ;;  %v3492_v27 = vld [vmem:[#allocation2 + $0x10c] ss:$16 sps:$4 sm:$0xff]  }
  0x71   :  { %1547 = vmatmul.mubr.bf16.gmra.mrb[12].mxu1 %v3730_v56 }
  0x72   :  { %1133 = vmatpush1.bf16.msra.mxu0 %v3364_v57  ;;  %1554 = vmatprep.mubr.bf16.mxu1 %v3732_v59  ;;  %v3429_v57 = vld [vmem:[#allocation2 + $0x180] ss:$16 sps:$4 sm:$0xff]  }
  0x73   :  { %1134 = vmatprep.subr.bf16.mxu0 %v3365_v58  ;;  %2869 = vmatpush3.bf16.msra.mxu1 %v3453_v28  ;;  %v3432_v58 = vld [vmem:[#allocation2 + $0x1a4] ss:$16 sps:$4 sm:$0xff]   ;;  %v3494_v28 = vld [vmem:[#allocation2 + $0x108] ss:$16 sps:$4 sm:$0xff]  }
  0x74   :  { %2870 = vmatprep.subr.bf16.mxu1 %v3454_v30  ;;  %v3527_v30 = vld [vmem:[#allocation7 + $0x88] sm:$0xff]  }
  0x76   :  { %1135 = vmatpush1.bf16.msra.mxu0 %v3367_v60  ;;  %v3438_v60 = vld [vmem:[#allocation2 + $0x1c4] ss:$16 sps:$4 sm:$0xff]  }
  0x77   :  { %1297 = vmatprep.subr.bf16.mxu0 %v3372_v61  ;;  %2871 = vmatpush3.bf16.msra.mxu1 %v3455_v31  ;;  %v3443_v61 = vld [vmem:[#allocation2 + $0x1c0] ss:$16 sps:$4 sm:$0xff]   ;;  %v3776_v31 = vld [vmem:[#allocation2 + $0x128] ss:$16 sps:$4 sm:$0xff]  }
  0x79   :  { %1137 = vmatmul.mubr.bf16.vlgmr.msra.gmra.mrb[0].mxu0 %v3712_v34  ;;  %1555 = vmatmul.mubr.bf16.gmra.mrb[16].mxu1 %v3736_v1  ;;  %v3401_v34 = vld [vmem:[#allocation2 + $0x100] ss:$16 sps:$4 sm:$0xff]  }
  0x7a   :  { %1298 = vmatpush1.bf16.msra.mxu0 %v3370_v0  ;;  %1146 = vmatprep.mubr.bf16.mxu0 %v3714_v37  ;;  %v3436_v37 = vld [vmem:[#allocation5 + $0x25c] ss:$12 sps:$4 sm:$0xff]  }
  0x7b   :  { %1562 = vmatprep.mubr.bf16.mxu1 %v3738_v2  ;;  %1299 = vmatprep.subr.bf16.mxu0 %v3380_v4  ;;  %v3458_v0 = vld [vmem:[#allocation2 + $0xc] ss:$16 sps:$4 sm:$0xff]   ;;  %v3517_v4 = vld [vmem:[#allocation7] sm:$0xff]  }
  0x7e   :  { %1300 = vmatpush1.bf16.msra.mxu0 %v3378_v3  ;;  %v3462_v3 = vld [vmem:[#allocation2 + $0x2c] ss:$16 sps:$4 sm:$0xff]  }
  0x7f   :  { %1301 = vmatprep.subr.bf16.mxu0 %v3386_v5  ;;  %v3467_v5 = vld [vmem:[#allocation2 + $0x28] ss:$16 sps:$4 sm:$0xff]  }
  0x81   :  { %1147 = vmatmul.mubr.bf16.gmra.mrb[4].mxu0 %v3718_v40  ;;  %1563 = vmatmul.mubr.bf16.gmra.mrb[20].mxu1 %v3744_v8  ;;  %v3409_v40 = vld [vmem:[#allocation2 + $0x120] ss:$16 sps:$4 sm:$0xff]  }
  0x82   :  { %1156 = vmatprep.mubr.bf16.mxu0 %v3720_v43  ;;  %1570 = vmatprep.mubr.bf16.mxu1 %v3746_v9  ;;  %v3450_v43 = vld [vmem:[#allocation5 + $0x28c] ss:$12 sps:$4 sm:$0xff]  }
  0x83   :  { %1302 = vmatpush1.bf16.msra.mxu0 %v3384_v10  ;;  %v3474_v10 = vld [vmem:[#allocation2 + $0x6c] ss:$16 sps:$4 sm:$0xff]  }
  0x84   :  { %1303 = vmatprep.subr.bf16.mxu0 %v3394_v11  ;;  %v3479_v11 = vld [vmem:[#allocation2 + $0x68] ss:$16 sps:$4 sm:$0xff]  }
  0x87   :  { %1304 = vmatpush1.bf16.msra.mxu0 %v3392_v14  ;;  %v3521_v14 = vld [vmem:[#allocation7 + $0x10] sm:$0xff]  }
  0x88   :  { %1305 = vmatprep.subr.bf16.mxu0 %v3400_v15  ;;  %v3522_v15 = vld [vmem:[#allocation7 + $0x58] sm:$0xff]  }
  0x89   :  { %1157 = vmatmul.mubr.bf16.gmra.mrb[8].mxu0 %v3724_v46  ;;  %1571 = vmatmul.mubr.bf16.gmra.mrb[24].mxu1 %v3752_v16  ;;  %v3461_v46 = vld [vmem:[#allocation5 + $0x2a4] ss:$12 sps:$4 sm:$0xff]  }
  0x8a   :  { %1166 = vmatprep.mubr.bf16.mxu0 %v3726_v51  ;;  %1578 = vmatprep.mubr.bf16.mxu1 %v3754_v17  ;;  %v3472_v51 = vld [vmem:[#allocation5 + $0x2d4] ss:$12 sps:$4 sm:$0xff]  }
  0x8b   :  { %1306 = vmatpush1.bf16.msra.mxu0 %v3398_v18  ;;  %v3483_v18 = vld [vmem:[#allocation2 + $0xac] ss:$16 sps:$4 sm:$0xff]  }
  0x8c   :  { %1307 = vmatprep.subr.bf16.mxu0 %v3408_v19  ;;  %v3485_v19 = vld [vmem:[#allocation2 + $0xa8] ss:$16 sps:$4 sm:$0xff]  }
  0x8f   :  { %1308 = vmatpush1.bf16.msra.mxu0 %v3406_v22  ;;  %v3525_v22 = vld [vmem:[#allocation7 + $0x20] sm:$0xff]  }
  0x90   :  { %1309 = vmatprep.subr.bf16.mxu0 %v3414_v24  ;;  %v3489_v24 = vld [vmem:[#allocation2 + $0xec] ss:$16 sps:$4 sm:$0xff]  }
  0x91   :  { %1167 = vmatmul.mubr.bf16.gmra.mrb[12].mxu0 %v3730_v56  ;;  %1579 = vmatmul.mubr.bf16.gmra.mrb[28].mxu1 %v3760_v23  ;;  %v3476_v56 = vld [vmem:[#allocation5 + $0x2e8] ss:$12 sps:$4 sm:$0xff]  }
  0x92   :  { %1176 = vmatprep.mubr.bf16.mxu0 %v3732_v59  ;;  %1586 = vmatprep.mubr.bf16.mxu1 %v3762_v25  ;;  %v3437_v59 = vld [vmem:[#allocation2 + $0x1a0] ss:$16 sps:$4 sm:$0xff]  }
  0x93   :  { %1310 = vmatpush1.bf16.msra.mxu0 %v3412_v26  ;;  %v3491_v26 = vld [vmem:[#allocation2 + $0xe8] ss:$16 sps:$4 sm:$0xff]  }
  0x94   :  { %1311 = vmatprep.subr.bf16.mxu0 %v3422_v29  ;;  %v3495_v29 = vld [vmem:[#allocation2 + $0x12c] ss:$16 sps:$4 sm:$0xff]  }
  0x97   :  { %1312 = vmatpush1.bf16.msra.mxu0 %v3420_v32  ;;  %v3778_v32 = vld [vmem:[#allocation2 + $0x14c] ss:$16 sps:$4 sm:$0xff]  }
  0x98   :  { %1313 = vmatprep.subr.bf16.mxu0 %v3428_v33  ;;  %v3528_v33 = vld [vmem:[#allocation7 + $0x68] sm:$0xff]  }
  0x99   :  { %1177 = vmatmul.mubr.bf16.gmra.mrb[16].mxu0 %v3736_v1  ;;  %1587 = vmatmul.mubr.bf16.gmra.mrb[32].mxu1 %v3401_v34  ;;  %v3516_v1 = vld [vmem:[#allocation7 + $0x40] sm:$0xff]  }
  0x9a   :  { %1186 = vmatprep.mubr.bf16.mxu0 %v3738_v2  ;;  %1594 = vmatprep.mubr.bf16.mxu1 %v3404_v35  ;;  %v3456_v2 = vld [vmem:[#allocation2 + $0x8] ss:$16 sps:$4 sm:$0xff]  }
  0x9b   :  { %1314 = vmatpush1.bf16.msra.mxu0 %v3426_v36  ;;  %2968 = vmatprep.subr.bf16.mxu1 %v3516_v1  ;;  %v3782_v36 = vld [vmem:[#allocation2 + $0x148] ss:$16 sps:$4 sm:$0xff]   ;;  %v3534_v1 = vld [vmem:[#allocation7 + $0x70] sm:$0xff]  }
  0x9c   :  { %1315 = vmatprep.subr.bf16.mxu0 %v3436_v37  ;;  %v3784_v37 = vld [vmem:[#allocation2 + $0x16c] ss:$16 sps:$4 sm:$0xff]  }
  0x9f   :  { %1316 = vmatpush1.bf16.msra.mxu0 %v3434_v38  ;;  %v3531_v38 = vld [vmem:[#allocation7 + $0x98] sm:$0xff]  }
  0xa0   :  { %1317 = vmatprep.subr.bf16.mxu0 %v3442_v39 }
  0xa1   :  { %1187 = vmatmul.mubr.bf16.gmra.mrb[20].mxu0 %v3744_v8  ;;  %1595 = vmatmul.mubr.bf16.gmra.mrb[36].mxu1 %v3409_v40  ;;  %v3519_v8 = vld [vmem:[#allocation7 + $0x8] sm:$0xff]  }
  0xa2   :  { %1196 = vmatprep.mubr.bf16.mxu0 %v3746_v9  ;;  %1602 = vmatprep.mubr.bf16.mxu1 %v3410_v41  ;;  %v3473_v9 = vld [vmem:[#allocation2 + $0x48] ss:$16 sps:$4 sm:$0xff]  }
  0xa3   :  { %1318 = vmatpush1.bf16.msra.mxu0 %v3440_v42  ;;  %v3790_v42 = vld [vmem:[#allocation2 + $0x18c] ss:$16 sps:$4 sm:$0xff]  }
  0xa4   :  { %1319 = vmatprep.subr.bf16.mxu0 %v3450_v43 }
  0xa7   :  { %1320 = vmatpush1.bf16.msra.mxu0 %v3448_v44 }
  0xa8   :  { %1321 = vmatprep.subr.bf16.mxu0 %v3461_v46 }
  0xa9   :  { %1197 = vmatmul.mubr.bf16.gmra.mrb[24].mxu0 %v3752_v16  ;;  %1603 = vmatmul.mubr.bf16.gmra.mrb[40].mxu1 %v3415_v45  ;;  %v3523_v16 = vld [vmem:[#allocation7 + $0x18] sm:$0xff]  }
  0xaa   :  { %1206 = vmatprep.mubr.bf16.mxu0 %v3754_v17  ;;  %1610 = vmatprep.mubr.bf16.mxu1 %v3418_v47  ;;  %v3482_v17 = vld [vmem:[#allocation2 + $0x88] ss:$16 sps:$4 sm:$0xff]  }
  0xab   :  { %1322 = vmatpush1.bf16.msra.mxu0 %v3459_v48  ;;  %v3533_v48 = vld [vmem:[#allocation7 + $0xa8] sm:$0xff]  }
  0xac   :  { %1323 = vmatprep.subr.bf16.mxu0 %v3466_v49 }
  0xaf   :  { %1324 = vmatpush1.bf16.msra.mxu0 %v3464_v50  ;;  %v3798_v50 = vld [vmem:[#allocation2 + $0x188] ss:$16 sps:$4 sm:$0xff]  }
  0xb0   :  { %1325 = vmatprep.subr.bf16.mxu0 %v3472_v51 }
  0xb1   :  { %1207 = vmatmul.mubr.bf16.gmra.mrb[28].mxu0 %v3760_v23  ;;  %1611 = vmatmul.mubr.bf16.gmra.mrb[44].mxu1 %v3423_v52  ;;  %v3488_v23 = vld [vmem:[#allocation2 + $0xc8] ss:$16 sps:$4 sm:$0xff]  }
  0xb2   :  { %1216 = vmatprep.mubr.bf16.mxu0 %v3762_v25  ;;  %1618 = vmatprep.mubr.bf16.mxu1 %v3424_v53  ;;  %v3526_v25 = vld [vmem:[#allocation7 + $0x80] sm:$0xff]  }
  0xb3   :  { %1326 = vmatpush1.bf16.msra.mxu0 %v3470_v54 }
  0xb4   :  { %1327 = vmatprep.subr.bf16.mxu0 %v3478_v55  ;;  %v3536_v55 = vld [vmem:[#allocation7 + $0xb0] sm:$0xff]  }
  0xb7   :  { %1328 = vmatpush1.bf16.msra.mxu0 %v3476_v56 }
  0xb8   :  { %3104 = vmatprep.subr.bf16.mxu0 %v3526_v25 }
  0xb9   :  { %1217 = vmatmul.mubr.bf16.gmra.mrb[32].mxu0 %v3401_v34  ;;  %1619 = vmatmul.mubr.bf16.gmra.mrb[48].mxu1 %v3429_v57  ;;  %v3529_v34 = vld [vmem:[#allocation7 + $0x28] sm:$0xff]  }
  0xba   :  { %1226 = vmatprep.mubr.bf16.mxu0 %v3404_v35  ;;  %1626 = vmatprep.mubr.bf16.mxu1 %v3432_v58  ;;  %v3530_v35 = vld [vmem:[#allocation7 + $0x90] sm:$0xff]  }
  0xc1   :  { %1227 = vmatmul.mubr.bf16.gmra.mrb[36].mxu0 %v3409_v40  ;;  %1627 = vmatmul.mubr.bf16.gmra.mrb[52].mxu1 %v3437_v59  ;;  %v3788_v40 = vld [vmem:[#allocation2 + $0x168] ss:$16 sps:$4 sm:$0xff]  }
  0xc2   :  { %1236 = vmatprep.mubr.bf16.mxu0 %v3410_v41  ;;  %1634 = vmatprep.mubr.bf16.mxu1 %v3438_v60 }
  0xc9   :  { %1237 = vmatmul.mubr.bf16.gmra.mrb[40].mxu0 %v3415_v45  ;;  %1635 = vmatmul.mubr.bf16.gmra.mrb[56].mxu1 %v3443_v61  ;;  %v3532_v45 = vld [vmem:[#allocation7 + $0xa0] sm:$0xff]  }
  0xca   :  { %1246 = vmatprep.mubr.bf16.mxu0 %v3418_v47  ;;  %1642 = vmatprep.mubr.bf16.mxu1 %v3446_v62 }
  0xd1   :  { %1247 = vmatmul.mubr.bf16.gmra.mrb[44].mxu0 %v3423_v52  ;;  %1643 = vmatmul.mubr.bf16.gmra.mrb[60].mxu1 %v3451_v63  ;;  %v3800_v52 = vld [vmem:[#allocation2 + $0x1ac] ss:$16 sps:$4 sm:$0xff]  }
  0xd2   :  { %1256 = vmatprep.mubr.bf16.mxu0 %v3424_v53  ;;  %1683 = vmatprep.mubr.bf16.mxu1 %v3458_v0 }
  0xd9   :  { %1257 = vmatmul.mubr.bf16.gmra.mrb[48].mxu0 %v3429_v57  ;;  %1684 = vmatmul.mubr.bf16.vlgmr.msra.gmra.mrb[64].mxu1 %v3456_v2 }
  0xda   :  { %1266 = vmatprep.mubr.bf16.mxu0 %v3432_v58  ;;  %1691 = vmatprep.mubr.bf16.mxu1 %v3462_v3  ;;  %v3537_v58 = vld [vmem:[#allocation7 + $0xb8] sm:$0xff]  }
  0xdb   :  { %2969 = vmatpush3.bf16.msra.mxu1 %v3517_v4 }
  0xdc   :  { %2970 = vmatprep.subr.bf16.mxu1 %v3518_v7 }
  0xdf   :  { %2971 = vmatpush3.bf16.msra.mxu1 %v3519_v8  ;;  %v3513_v8 = vld [vmem:[#allocation2 + $0x1ec] ss:$16 sps:$4 sm:$0xff]  }
  0xe0   :  { %2972 = vmatprep.subr.bf16.mxu1 %v3520_v13 }
  0xe1   :  { %1267 = vmatmul.mubr.bf16.gmra.mrb[52].mxu0 %v3437_v59  ;;  %1692 = vmatmul.mubr.bf16.gmra.mrb[68].mxu1 %v3467_v5 }
  0xe2   :  { %1276 = vmatprep.mubr.bf16.mxu0 %v3438_v60  ;;  %1699 = vmatprep.mubr.bf16.mxu1 %v3468_v6  ;;  %v3509_v60 = vld [vmem:[#allocation2 + $0x1a8] ss:$16 sps:$4 sm:$0xff]  }
  0xe3   :  { %2973 = vmatpush3.bf16.msra.mxu1 %v3521_v14  ;;  %v3538_v14 = vld [vmem:[#allocation7 + $0x78] sm:$0xff]  }
  0xe4   :  { %2974 = vmatprep.subr.bf16.mxu1 %v3522_v15  ;;  %v3539_v15 = vld [vmem:[#allocation7 + $0x38] sm:$0xff]  }
  0xe7   :  { %2975 = vmatpush3.bf16.msra.mxu1 %v3523_v16  ;;  %v3515_v16 = vld [vmem:[#allocation2 + $0x1e8] ss:$16 sps:$4 sm:$0xff]  }
  0xe8   :  { %2976 = vmatprep.subr.bf16.mxu1 %v3524_v21 }
  0xe9   :  { %1277 = vmatmul.mubr.bf16.gmra.mrb[56].mxu0 %v3443_v61  ;;  %1700 = vmatmul.mubr.bf16.gmra.mrb[72].mxu1 %v3473_v9 }
  0xea   :  { %1286 = vmatprep.mubr.bf16.mxu0 %v3446_v62  ;;  %1707 = vmatprep.mubr.bf16.mxu1 %v3474_v10  ;;  %v3510_v62 = vld [vmem:[#allocation2 + $0x1cc] ss:$16 sps:$4 sm:$0xff]  }
  0xeb   :  { %2977 = vmatpush3.bf16.msra.mxu1 %v3525_v22 }
  0xec   :  { %2978 = vmatprep.subr.bf16.mxu1 %v3528_v33 }
  0xef   :  { %2979 = vmatpush3.bf16.msra.mxu1 %v3529_v34 }
  0xf0   :  { %2980 = vmatprep.subr.bf16.mxu1 %v3534_v1 }
  0xf1   :  { %1287 = vmatmul.mubr.bf16.gmra.mrb[60].mxu0 %v3451_v63  ;;  %1708 = vmatmul.mubr.bf16.gmra.mrb[76].mxu1 %v3479_v11 }
  0xf2   :  { %1329 = vmatprep.mubr.bf16.mxu0 %v3458_v0  ;;  %1715 = vmatprep.mubr.bf16.mxu1 %v3480_v12 }
  0xf9   :  { %1330 = vmatmul.mubr.bf16.vlgmr.msra.gmra.mrb[0].mxu0 %v3456_v2  ;;  %1716 = vmatmul.mubr.bf16.gmra.mrb[80].mxu1 %v3482_v17  ;;  %v3535_v2 = vld [vmem:[#allocation7 + $0x30] sm:$0xff]  }
  0xfa   :  { %1339 = vmatprep.mubr.bf16.mxu0 %v3462_v3  ;;  %1723 = vmatprep.mubr.bf16.mxu1 %v3483_v18 }
  0xfb   :  { %3105 = vmatpush3.bf16.msra.mxu0 %v3526_v25  ;;  %2981 = vmatpush3.bf16.msra.mxu1 %v3535_v2 }
  0xfc   :  { %3106 = vmatprep.subr.bf16.mxu0 %v3527_v30  ;;  %2982 = vmatprep.subr.bf16.mxu1 %v3538_v14 }
  0xff   :  { %3107 = vmatpush3.bf16.msra.mxu0 %v3527_v30  ;;  %2983 = vmatpush3.bf16.msra.mxu1 %v3539_v15 }
 0x100   :  { %3108 = vmatprep.subr.bf16.mxu0 %v3530_v35 }
 0x101   :  { %1340 = vmatmul.mubr.bf16.gmra.mrb[4].mxu0 %v3467_v5  ;;  %1724 = vmatmul.mubr.bf16.gmra.mrb[84].mxu1 %v3485_v19 }
 0x102   :  { %1349 = vmatprep.mubr.bf16.mxu0 %v3468_v6  ;;  %1731 = vmatprep.mubr.bf16.mxu1 %v3486_v20  ;;  %v3512_v6 = vld [vmem:[#allocation2 + $0x1c8] ss:$16 sps:$4 sm:$0xff]  }
 0x103   :  { %3109 = vmatpush3.bf16.msra.mxu0 %v3530_v35 }
 0x104   :  { %3110 = vmatprep.subr.bf16.mxu0 %v3531_v38 }
 0x107   :  { %3111 = vmatpush3.bf16.msra.mxu0 %v3531_v38 }
 0x108   :  { %3112 = vmatprep.subr.bf16.mxu0 %v3532_v45 }
 0x109   :  { %1350 = vmatmul.mubr.bf16.gmra.mrb[8].mxu0 %v3473_v9  ;;  %1732 = vmatmul.mubr.bf16.gmra.mrb[88].mxu1 %v3488_v23 }
 0x10a   :  { %1359 = vmatprep.mubr.bf16.mxu0 %v3474_v10  ;;  %1739 = vmatprep.mubr.bf16.mxu1 %v3489_v24 }
 0x10b   :  { %3113 = vmatpush3.bf16.msra.mxu0 %v3532_v45 }
 0x10c   :  { %3114 = vmatprep.subr.bf16.mxu0 %v3533_v48 }
 0x10f   :  { %3115 = vmatpush3.bf16.msra.mxu0 %v3533_v48 }
 0x110   :  { %3116 = vmatprep.subr.bf16.mxu0 %v3536_v55 }
 0x111   :  { %1360 = vmatmul.mubr.bf16.gmra.mrb[12].mxu0 %v3479_v11  ;;  %1740 = vmatmul.mubr.bf16.gmra.mrb[92].mxu1 %v3491_v26 }
 0x112   :  { %1369 = vmatprep.mubr.bf16.mxu0 %v3480_v12  ;;  %1747 = vmatprep.mubr.bf16.mxu1 %v3492_v27 }
 0x113   :  { %3117 = vmatpush3.bf16.msra.mxu0 %v3536_v55 }
 0x114   :  { %3118 = vmatprep.subr.bf16.mxu0 %v3537_v58 }
 0x117   :  { %3119 = vmatpush3.bf16.msra.mxu0 %v3537_v58 }
 0x119   :  { %1370 = vmatmul.mubr.bf16.gmra.mrb[16].mxu0 %v3482_v17  ;;  %1748 = vmatmul.mubr.bf16.gmra.mrb[96].mxu1 %v3494_v28 }
 0x11a   :  { %1379 = vmatprep.mubr.bf16.mxu0 %v3483_v18  ;;  %1755 = vmatprep.mubr.bf16.mxu1 %v3495_v29 }
 0x121   :  { %1380 = vmatmul.mubr.bf16.gmra.mrb[20].mxu0 %v3485_v19  ;;  %1756 = vmatmul.mubr.bf16.gmra.mrb[100].mxu1 %v3776_v31 }
 0x122   :  { %1389 = vmatprep.mubr.bf16.mxu0 %v3486_v20  ;;  %1763 = vmatprep.mubr.bf16.mxu1 %v3778_v32 }
 0x129   :  { %1390 = vmatmul.mubr.bf16.gmra.mrb[24].mxu0 %v3488_v23  ;;  %1764 = vmatmul.mubr.bf16.gmra.mrb[104].mxu1 %v3782_v36 }
 0x12a   :  { %1399 = vmatprep.mubr.bf16.mxu0 %v3489_v24  ;;  %1771 = vmatprep.mubr.bf16.mxu1 %v3784_v37 }
 0x12c   :  { %v2760_v39 = vpop.f32.mrb[0].mxu1 }
 0x12d   :  { %v2761_v41 = vpop.f32.mrb[1].mxu1 }
 0x12e   :  { %v3792_v43 = vadd.f32 %v2761_v41, %v2760_v39  ;;  %v2763_v44 = vpop.f32.mrb[2].mxu1 }
 0x12f   :  { %v2764_v46 = vpop.f32.mrb[3].mxu1 }
 0x130   :  { %v3794_v47 = vadd.f32 %v2764_v46, %v2763_v44 }
 0x131   :  { %1400 = vmatmul.mubr.bf16.gmra.mrb[28].mxu0 %v3491_v26  ;;  %1772 = vmatmul.mubr.bf16.gmra.mrb[108].mxu1 %v3788_v40 }
 0x132   :  { %1409 = vmatprep.mubr.bf16.mxu0 %v3492_v27  ;;  %1779 = vmatprep.mubr.bf16.mxu1 %v3790_v42 }
 0x134   :  { %v2766_v49 = vpop.f32.mrb[4].mxu1 }
 0x135   :  { %v2767_v51 = vpop.f32.mrb[5].mxu1 }
 0x136   :  { %v3802_v53 = vadd.f32 %v2767_v51, %v2766_v49  ;;  %v2769_v54 = vpop.f32.mrb[6].mxu1 }
 0x137   :  { %v2770_v56 = vpop.f32.mrb[7].mxu1 }
 0x138   :  { %v3804_v57 = vadd.f32 %v2770_v56, %v2769_v54 }
 0x139   :  { %1410 = vmatmul.mubr.bf16.gmra.mrb[32].mxu0 %v3494_v28  ;;  %1780 = vmatmul.mubr.bf16.gmra.mrb[112].mxu1 %v3798_v50 }
 0x13a   :  { %1419 = vmatprep.mubr.bf16.mxu0 %v3495_v29  ;;  %1787 = vmatprep.mubr.bf16.mxu1 %v3800_v52 }
 0x13c   :  { %v2772_v59 = vpop.f32.mrb[8].mxu1 }
 0x13d   :  { %v2773_v61 = vpop.f32.mrb[9].mxu1 }
 0x13e   :  { %v3808_v63 = vadd.f32 %v2773_v61, %v2772_v59  ;;  %v2775_v0 = vpop.f32.mrb[10].mxu1 }
 0x13f   :  { %v2776_v3 = vpop.f32.mrb[11].mxu1 }
 0x140   :  { %v3811_v4 = vadd.f32 %v2776_v3, %v2775_v0 }
 0x141   :  { %1420 = vmatmul.mubr.bf16.gmra.mrb[36].mxu0 %v3776_v31  ;;  %1788 = vmatmul.mubr.bf16.gmra.mrb[116].mxu1 %v3509_v60 }
 0x142   :  { %1429 = vmatprep.mubr.bf16.mxu0 %v3778_v32  ;;  %1795 = vmatprep.mubr.bf16.mxu1 %v3510_v62 }
 0x144   :  { %v2778_v5 = vpop.f32.mrb[12].mxu1 }
 0x145   :  { %v2779_v7 = vpop.f32.mrb[13].mxu1 }
 0x146   :  { %v3814_v9 = vadd.f32 %v2779_v7, %v2778_v5  ;;  %v2781_v10 = vpop.f32.mrb[14].mxu1 }
 0x147   :  { %v2782_v11 = vpop.f32.mrb[15].mxu1 }
 0x148   :  { %v3817_v12 = vadd.f32 %v2782_v11, %v2781_v10 }
 0x149   :  { %1430 = vmatmul.mubr.bf16.gmra.mrb[40].mxu0 %v3782_v36  ;;  %1796 = vmatmul.mubr.bf16.gmra.mrb[120].mxu1 %v3512_v6 }
 0x14a   :  { %1439 = vmatprep.mubr.bf16.mxu0 %v3784_v37  ;;  %1803 = vmatprep.mubr.bf16.mxu1 %v3513_v8 }
 0x14c   :  { %v2784_v13 = vpop.f32.mrb[16].mxu1 }
 0x14d   :  { %v2785_v17 = vpop.f32.mrb[17].mxu1 }
 0x14e   :  { %v3820_v18 = vadd.f32 %v2785_v17, %v2784_v13  ;;  %v2787_v19 = vpop.f32.mrb[18].mxu1 }
 0x14f   :  { %v2788_v20 = vpop.f32.mrb[19].mxu1 }
 0x150   :  { %v3823_v21 = vadd.f32 %v2788_v20, %v2787_v19 }
 0x151   :  { %1440 = vmatmul.mubr.bf16.gmra.mrb[44].mxu0 %v3788_v40  ;;  %1804 = vmatmul.mubr.bf16.gmra.mrb[124].mxu1 %v3515_v16 }
 0x152   :  { %1449 = vmatprep.mubr.bf16.mxu0 %v3790_v42 }
 0x154   :  { %v2790_v22 = vpop.f32.mrb[20].mxu1 }
 0x155   :  { %v2791_v23 = vpop.f32.mrb[21].mxu1 }
 0x156   :  { %v3826_v24 = vadd.f32 %v2791_v23, %v2790_v22  ;;  %v2793_v25 = vpop.f32.mrb[22].mxu1 }
 0x157   :  { %v2794_v26 = vpop.f32.mrb[23].mxu1 }
 0x158   :  { %v3829_v27 = vadd.f32 %v2794_v26, %v2793_v25  ;;  %v257_v25 = vlaneseq }
 0x159   :  { %1450 = vmatmul.mubr.bf16.gmra.mrb[48].mxu0 %v3798_v50 }
 0x15a   :  { %1459 = vmatprep.mubr.bf16.mxu0 %v3800_v52 }
 0x15c   :  { %v2796_v28 = vpop.f32.mrb[24].mxu1 }
 0x15d   :  { %v2797_v29 = vpop.f32.mrb[25].mxu1 }
 0x15e   :  { %v3832_v30 = vadd.f32 %v2797_v29, %v2796_v28  ;;  %v2799_v31 = vpop.f32.mrb[26].mxu1 }
 0x15f   :  { %v2800_v32 = vpop.f32.mrb[27].mxu1 }
 0x160   :  { %v3834_v33 = vadd.f32 %v2800_v32, %v2799_v31  ;;  %v3868_v32 = vshrl.u32 %v257_v25, 7 }
 0x161   :  { %1460 = vmatmul.mubr.bf16.gmra.mrb[52].mxu0 %v3509_v60 }
 0x162   :  { %1469 = vmatprep.mubr.bf16.mxu0 %v3510_v62 }
 0x164   :  { %v2802_v34 = vpop.f32.mrb[28].mxu1 }
 0x165   :  { %v2803_v35 = vpop.f32.mrb[29].mxu1 }
 0x166   :  { %v3836_v36 = vadd.f32 %v2803_v35, %v2802_v34  ;;  %v2805_v37 = vpop.f32.mrb[30].mxu1 }
 0x167   :  { %v2806_v38 = vpop.f32.mrb[31].mxu1 }
 0x168   :  { %v3838_v39 = vadd.f32 %v2806_v38, %v2805_v37  ;;  %v267_v37 = vsub.s32 2, %v3868_v32 }
 0x169   :  { %1470 = vmatmul.mubr.bf16.gmra.mrb[56].mxu0 %v3512_v6 }
 0x16a   :  { %1479 = vmatprep.mubr.bf16.mxu0 %v3513_v8 }
 0x16c   :  { %v2808_v40 = vpop.f32.mrb[32].mxu1 }
 0x16d   :  { %v2809_v41 = vpop.f32.mrb[33].mxu1 }
 0x16e   :  { %v3840_v42 = vadd.f32 %v2809_v41, %v2808_v40  ;;  %v2811_v44 = vpop.f32.mrb[34].mxu1  ;;  %v255_v41 = vld [vmem:[%s4104_s2] sm:$0x7] }
 0x16f   :  { %v2812_v45 = vpop.f32.mrb[35].mxu1 }
 0x170   :  { %v3842_v46 = vadd.f32 %v2812_v45, %v2811_v44 }
 0x171   :  { %1480 = vmatmul.mubr.bf16.gmra.mrb[60].mxu0 %v3515_v16 }
 0x174   :  { %v2814_v48 = vpop.f32.mrb[36].mxu1 }
 0x175   :  { %v2815_v49 = vpop.f32.mrb[37].mxu1 }
 0x176   :  { %v3844_v50 = vadd.f32 %v2815_v49, %v2814_v48  ;;  %v2817_v51 = vpop.f32.mrb[38].mxu1  ;;  %v3878_v48 = vrot.slane %v255_v41, %v267_v37 }
 0x177   :  { %v2818_v52 = vpop.f32.mrb[39].mxu1 }
 0x178   :  { %v3846_v54 = vadd.f32 %v2818_v52, %v2817_v51  ;;  %v1525_v52 = vadd.f32 %v3792_v43, %v3878_v48 }
 0x17c   :  { %v2820_v55 = vpop.f32.mrb[40].mxu1 }
 0x17d   :  { %v2821_v56 = vpop.f32.mrb[41].mxu1 }
 0x17e   :  { %v3848_v58 = vadd.f32 %v2821_v56, %v2820_v55  ;;  %v2823_v59 = vpop.f32.mrb[42].mxu1 }
 0x17f   :  { %v2824_v60 = vpop.f32.mrb[43].mxu1 }
 0x180   :  { %v3850_v61 = vadd.f32 %v2824_v60, %v2823_v59  ;;  %v1528_v60 = vadd.f32 %v3794_v47, %v3878_v48 }
 0x184   :  { %v2826_v62 = vpop.f32.mrb[44].mxu1 }
 0x185   :  { %v2827_v0 = vpop.f32.mrb[45].mxu1 }
 0x186   :  { %v3852_v1 = vadd.f32 %v2827_v0, %v2826_v62  ;;  %v2829_v2 = vpop.f32.mrb[46].mxu1 }
 0x187   :  { %v2830_v3 = vpop.f32.mrb[47].mxu1 }
 0x188   :  { %v3854_v5 = vadd.f32 %v2830_v3, %v2829_v2 }
 0x18c   :  { %v2832_v6 = vpop.f32.mrb[48].mxu1 }
 0x18d   :  { %v2833_v7 = vpop.f32.mrb[49].mxu1 }
 0x18e   :  { %v3856_v8 = vadd.f32 %v2833_v7, %v2832_v6  ;;  %v2835_v10 = vpop.f32.mrb[50].mxu1 }
 0x18f   :  { %v2836_v11 = vpop.f32.mrb[51].mxu1 }
 0x190   :  { %v3858_v13 = vadd.f32 %v2836_v11, %v2835_v10  ;;  %v1533_v11 = vadd.f32 %v3802_v53, %v3878_v48 }
 0x194   :  { %v2838_v14 = vpop.f32.mrb[52].mxu1 }
 0x195   :  { %v2839_v15 = vpop.f32.mrb[53].mxu1 }
 0x196   :  { %v3860_v16 = vadd.f32 %v2839_v15, %v2838_v14  ;;  %v2841_v17 = vpop.f32.mrb[54].mxu1 }
 0x197   :  { %v2842_v19 = vpop.f32.mrb[55].mxu1 }
 0x198   :  { %v3862_v20 = vadd.f32 %v2842_v19, %v2841_v17  ;;  %v1536_v19 = vadd.f32 %v3804_v57, %v3878_v48 }
 0x19c   :  { %v2844_v22 = vpop.f32.mrb[56].mxu1 }
 0x19d   :  { %v2845_v23 = vpop.f32.mrb[57].mxu1 }
 0x19e   :  { %v3864_v26 = vadd.f32 %v2845_v23, %v2844_v22  ;;  %v2847_v28 = vpop.f32.mrb[58].mxu1 }
 0x19f   :  { %v2848_v29 = vpop.f32.mrb[59].mxu1 }
 0x1a0   :  { %v3866_v31 = vadd.f32 %v2848_v29, %v2847_v28 }
 0x1a4   :  { %v2850_v34 = vpop.f32.mrb[60].mxu1 }
 0x1a5   :  { %v2851_v35 = vpop.f32.mrb[61].mxu1 }
 0x1a6   :  { %v3871_v38 = vadd.f32 %v2851_v35, %v2850_v34  ;;  %v2853_v40 = vpop.f32.mrb[62].mxu1  ;;  %v1541_v35 = vadd.f32 %v3808_v63, %v3878_v48  ;;  %v1549_v63 = vadd.f32 %v3814_v9, %v3878_v48 }
 0x1a7   :  { %v2854_v44 = vpop.f32.mrb[63].mxu1 }
 0x1a8   :  { %v3876_v45 = vadd.f32 %v2854_v44, %v2853_v40 }
 0x1ac   :  { %v2872_v49 = vpop.f32.mrb[64].mxu1 }
 0x1ad   :  { %v2873_v51 = vpop.f32.mrb[65].mxu1 }
 0x1ae   :  { %v2874_v55 = vadd.f32 %v2873_v51, %v2872_v49  ;;  %v2875_v56 = vpop.f32.mrb[66].mxu1  ;;  %v1544_v49 = vadd.f32 %v3811_v4, %v3878_v48  ;;  %v1552_v4 = vadd.f32 %v3817_v12, %v3878_v48  ;;  %v1557_v12 = vadd.f32 %v3820_v18, %v3878_v48 }
 0x1af   :  { %v2876_v59 = vpop.f32.mrb[67].mxu1 }
 0x1b0   :  { %v1686_v62 = vadd.f32 %v2874_v55, %v1525_v52  ;;  %v2877_v0 = vadd.f32 %v2876_v59, %v2875_v56 }
 0x1b2   :  { %v1689_v2 = vadd.f32 %v2877_v0, %v1528_v60  ;;  %v1814_v3 = vmax.f32 %v1686_v62, 0.0  ;;  %v259_v60 = vsub.s32 0, %v3868_v32  ;;  %v263_v0 = vsub.s32 1, %v3868_v32 }
 0x1b4   :  { %v1817_v6 = vmax.f32 %v1689_v2, 0.0  ;;  %v2878_v7 = vpop.f32.mrb[68].mxu1 }
 0x1b5   :  { %v2879_v10 = vpop.f32.mrb[69].mxu1 }
 0x1b6   :  { %v2880_v14 = vadd.f32 %v2879_v10, %v2878_v7  ;;  %v2881_v15 = vpop.f32.mrb[70].mxu1  ;;  %v1910_v17 = vpack.c.bf16 %v1817_v6, %v1814_v3 }
 0x1b7   :  { %v2882_v43 = vpop.f32.mrb[71].mxu1 }
 0x1b8   :  { %v1694_v22 = vadd.f32 %v2880_v14, %v1533_v11  ;;  %v2883_v23 = vadd.f32 %v2882_v43, %v2881_v15  ;;  %3120 = vmatprep.mubr.bf16.mxu0 %v1910_v17  ;;  %v3898_v14 = vrot.slane %v255_v41, %v259_v60  ;;  %v3900_v15 = vrot.slane %v255_v41, %v263_v0 }
 0x1ba   :  { %v1697_v47 = vadd.f32 %v2883_v23, %v1536_v19  ;;  %v1820_v25 = vmax.f32 %v1694_v22, 0.0 }
 0x1bc   :  { %v1823_v28 = vmax.f32 %v1697_v47, 0.0  ;;  %v2884_v29 = vpop.f32.mrb[72].mxu1 }
 0x1bd   :  { %v2885_v34 = vpop.f32.mrb[73].mxu1 }
 0x1be   :  { %v1913_v37 = vpack.c.bf16 %v1823_v28, %v1820_v25  ;;  %v2886_v53 = vadd.f32 %v2885_v34, %v2884_v29  ;;  %v2887_v40 = vpop.f32.mrb[74].mxu1 }
 0x1bf   :  { %v2888_v44 = vpop.f32.mrb[75].mxu1 }
 0x1c0   :  { %v1702_v51 = vadd.f32 %v2886_v53, %v1541_v35  ;;  %v2889_v57 = vadd.f32 %v2888_v44, %v2887_v40  ;;  %3121 = vmatmul.mubr.bf16.vlgmr.msra.gmra.mrb[64].mxu0 %v1913_v37  ;;  %v1560_v53 = vadd.f32 %v3823_v21, %v3878_v48 }
 0x1c2   :  { %v1705_v52 = vadd.f32 %v2889_v57, %v1544_v49  ;;  %v1826_v55 = vmax.f32 %v1702_v51, 0.0 }
 0x1c4   :  { %v1829_v56 = vmax.f32 %v1705_v52, 0.0  ;;  %v2890_v59 = vpop.f32.mrb[76].mxu1 }
 0x1c5   :  { %v2891_v62 = vpop.f32.mrb[77].mxu1 }
 0x1c6   :  { %v2892_v2 = vadd.f32 %v2891_v62, %v2890_v59  ;;  %v2893_v3 = vpop.f32.mrb[78].mxu1  ;;  %v1916_v6 = vpack.c.bf16 %v1829_v56, %v1826_v55 }
 0x1c7   :  { %v2894_v7 = vpop.f32.mrb[79].mxu1 }
 0x1c8   :  { %v1710_v10 = vadd.f32 %v2892_v2, %v1549_v63  ;;  %v2895_v11 = vadd.f32 %v2894_v7, %v2893_v3  ;;  %3124 = vmatprep.mubr.bf16.mxu0 %v1916_v6 }
 0x1ca   :  { %v1713_v17 = vadd.f32 %v2895_v11, %v1552_v4  ;;  %v1832_v32 = vmax.f32 %v1710_v10, 0.0  ;;  %v1565_v10 = vadd.f32 %v3826_v24, %v3878_v48 }
 0x1cc   :  { %v1331_v43 = vpop.f32.mrb[0].mxu0  ;;  %v1835_v19 = vmax.f32 %v1713_v17, 0.0  ;;  %v2896_v22 = vpop.f32.mrb[80].mxu1 }
 0x1cd   :  { %v3152_v9 = vadd.f32 %v1331_v43, %v3898_v14  ;;  %v1333_v23 = vpop.f32.mrb[1].mxu0  ;;  %v2897_v25 = vpop.f32.mrb[81].mxu1 }
 0x1ce   :  { %v3153_v47 = vadd.f32 %v1333_v23, %v3900_v15  ;;  %v1335_v28 = vpop.f32.mrb[2].mxu0  ;;  %v2898_v29 = vadd.f32 %v2897_v25, %v2896_v22  ;;  %v2899_v41 = vpop.f32.mrb[82].mxu1  ;;  %v1919_v37 = vpack.c.bf16 %v1835_v19, %v1832_v32 }
 0x1cf   :  { %v3154_v34 = vadd.f32 %v1335_v28, %v3898_v14  ;;  %v1337_v35 = vpop.f32.mrb[3].mxu0  ;;  %v2900_v44 = vpop.f32.mrb[83].mxu1  ;;  %v1812_v49 = vmax.f32 %v3152_v9, 0.0  ;;  %v1568_v9 = vadd.f32 %v3829_v27, %v3878_v48 }
 0x1d0   :  { %v3155_v40 = vadd.f32 %v1337_v35, %v3900_v15  ;;  %v1718_v51 = vadd.f32 %v2898_v29, %v1557_v12  ;;  %v2901_v52 = vadd.f32 %v2900_v44, %v2899_v41  ;;  %3125 = vmatmul.mubr.bf16.gmra.mrb[68].mxu0 %v1919_v37  ;;  %v1813_v55 = vmax.f32 %v3153_v47, 0.0 }
 0x1d1   :  { %v1815_v57 = vmax.f32 %v3154_v34, 0.0 }
 0x1d2   :  { %v1816_v56 = vmax.f32 %v3155_v40, 0.0  ;;  %v1721_v59 = vadd.f32 %v2901_v52, %v1560_v53  ;;  %v1838_v0 = vmax.f32 %v1718_v51, 0.0 }
 0x1d3   :  { %v1908_v18 = vpack.c.bf16 %v1815_v57, %v1812_v49 }
 0x1d4   :  { %v1909_v60 = vpack.c.bf16 %v1816_v56, %v1813_v55  ;;  %v1341_v62 = vpop.f32.mrb[4].mxu0  ;;  %v1841_v63 = vmax.f32 %v1721_v59, 0.0  ;;  %v2902_v3 = vpop.f32.mrb[84].mxu1  ;;  %v1573_v55 = vadd.f32 %v3832_v30, %v3878_v48 }
 0x1d5   :  { %v3156_v2 = vadd.f32 %v1341_v62, %v3898_v14  ;;  %v1343_v21 = vpop.f32.mrb[5].mxu0  ;;  %v2903_v7 = vpop.f32.mrb[85].mxu1 }
 0x1d6   :  { %v3157_v6 = vadd.f32 %v1343_v21, %v3900_v15  ;;  %v1345_v4 = vpop.f32.mrb[6].mxu0  ;;  %2187 = vmatprep.mubr.bf16.mxu1 %v1909_v60  ;;  %v2904_v11 = vadd.f32 %v2903_v7, %v2902_v3  ;;  %v2905_v43 = vpop.f32.mrb[86].mxu1  ;;  %v1922_v19 = vpack.c.bf16 %v1841_v63, %v1838_v0  ;;  %v1576_v0 = vadd.f32 %v3834_v33, %v3878_v48 }
 0x1d7   :  { %v3158_v17 = vadd.f32 %v1345_v4, %v3898_v14  ;;  %v1347_v32 = vpop.f32.mrb[7].mxu0  ;;  %2188 = vmatmul.mubr.bf16.vlgmr.msra.gmra.mrb[128].mxu1 %v1908_v18  ;;  %v2906_v23 = vpop.f32.mrb[87].mxu1  ;;  %v1818_v47 = vmax.f32 %v3156_v2, 0.0 }
 0x1d8   :  { %v3159_v22 = vadd.f32 %v1347_v32, %v3900_v15  ;;  %v1726_v25 = vadd.f32 %v2904_v11, %v1565_v10  ;;  %v2907_v12 = vadd.f32 %v2906_v23, %v2905_v43  ;;  %3128 = vmatprep.mubr.bf16.mxu0 %v1922_v19  ;;  %v1819_v29 = vmax.f32 %v3157_v6, 0.0 }
 0x1d9   :  { %v1821_v28 = vmax.f32 %v3158_v17, 0.0 }
 0x1da   :  { %v1822_v24 = vmax.f32 %v3159_v22, 0.0  ;;  %v1729_v41 = vadd.f32 %v2907_v12, %v1568_v9  ;;  %v1844_v53 = vmax.f32 %v1726_v25, 0.0 }
 0x1db   :  { %v1911_v34 = vpack.c.bf16 %v1821_v28, %v1818_v47  ;;  %v1581_v28 = vadd.f32 %v3836_v36, %v3878_v48 }
 0x1dc   :  { %v1912_v35 = vpack.c.bf16 %v1822_v24, %v1819_v29  ;;  %v1351_v37 = vpop.f32.mrb[8].mxu0  ;;  %v1847_v40 = vmax.f32 %v1729_v41, 0.0  ;;  %v2908_v49 = vpop.f32.mrb[88].mxu1 }
 0x1dd   :  { %v3160_v44 = vadd.f32 %v1351_v37, %v3898_v14  ;;  %v1353_v27 = vpop.f32.mrb[9].mxu0  ;;  %v2909_v57 = vpop.f32.mrb[89].mxu1 }
 0x1de   :  { %v3161_v51 = vadd.f32 %v1353_v27, %v3900_v15  ;;  %v1355_v52 = vpop.f32.mrb[10].mxu0  ;;  %2195 = vmatprep.mubr.bf16.mxu1 %v1912_v35  ;;  %v2910_v56 = vadd.f32 %v2909_v57, %v2908_v49  ;;  %v2911_v59 = vpop.f32.mrb[90].mxu1  ;;  %v1925_v62 = vpack.c.bf16 %v1847_v40, %v1844_v53  ;;  %v1584_v35 = vadd.f32 %v3838_v39, %v3878_v48 }
 0x1df   :  { %v3162_v18 = vadd.f32 %v1355_v52, %v3898_v14  ;;  %v1357_v60 = vpop.f32.mrb[11].mxu0  ;;  %2196 = vmatmul.mubr.bf16.gmra.mrb[132].mxu1 %v1911_v34  ;;  %v2912_v2 = vpop.f32.mrb[91].mxu1  ;;  %v1824_v3 = vmax.f32 %v3160_v44, 0.0 }
 0x1e0   :  { %v3163_v63 = vadd.f32 %v1357_v60, %v3900_v15  ;;  %v1734_v21 = vadd.f32 %v2910_v56, %v1573_v55  ;;  %v2913_v7 = vadd.f32 %v2912_v2, %v2911_v59  ;;  %3129 = vmatmul.mubr.bf16.gmra.mrb[72].mxu0 %v1925_v62  ;;  %v1825_v4 = vmax.f32 %v3161_v51, 0.0 }
 0x1e1   :  { %v1827_v6 = vmax.f32 %v3162_v18, 0.0 }
 0x1e2   :  { %v1828_v30 = vmax.f32 %v3163_v63, 0.0  ;;  %v1737_v11 = vadd.f32 %v2913_v7, %v1576_v0  ;;  %v1850_v32 = vmax.f32 %v1734_v21, 0.0 }
 0x1e3   :  { %v1914_v10 = vpack.c.bf16 %v1827_v6, %v1824_v3  ;;  %v1589_v3 = vadd.f32 %v3840_v42, %v3878_v48 }
 0x1e4   :  { %v1915_v17 = vpack.c.bf16 %v1828_v30, %v1825_v4  ;;  %v1361_v43 = vpop.f32.mrb[12].mxu0  ;;  %v1853_v19 = vmax.f32 %v1737_v11, 0.0  ;;  %v2914_v22 = vpop.f32.mrb[92].mxu1 }
 0x1e5   :  { %v3164_v9 = vadd.f32 %v1361_v43, %v3898_v14  ;;  %v1363_v33 = vpop.f32.mrb[13].mxu0  ;;  %v2915_v47 = vpop.f32.mrb[93].mxu1 }
 0x1e6   :  { %v3165_v23 = vadd.f32 %v1363_v33, %v3900_v15  ;;  %v1365_v25 = vpop.f32.mrb[14].mxu0  ;;  %2203 = vmatprep.mubr.bf16.mxu1 %v1915_v17  ;;  %v2916_v12 = vadd.f32 %v2915_v47, %v2914_v22  ;;  %v2917_v24 = vpop.f32.mrb[94].mxu1  ;;  %v1928_v41 = vpack.c.bf16 %v1853_v19, %v1850_v32 }
 0x1e7   :  { %v3166_v29 = vadd.f32 %v1365_v25, %v3898_v14  ;;  %v1367_v34 = vpop.f32.mrb[15].mxu0  ;;  %2204 = vmatmul.mubr.bf16.gmra.mrb[136].mxu1 %v1914_v10  ;;  %v2918_v53 = vpop.f32.mrb[95].mxu1  ;;  %v1830_v40 = vmax.f32 %v3164_v9, 0.0  ;;  %v1592_v10 = vadd.f32 %v3842_v46, %v3878_v48 }
 0x1e8   :  { %v3167_v37 = vadd.f32 %v1367_v34, %v3900_v15  ;;  %v1742_v44 = vadd.f32 %v2916_v12, %v1581_v28  ;;  %v2919_v27 = vadd.f32 %v2918_v53, %v2917_v24  ;;  %3132 = vmatprep.mubr.bf16.mxu0 %v1928_v41  ;;  %v1831_v51 = vmax.f32 %v3165_v23, 0.0 }
 0x1e9   :  { %v1833_v49 = vmax.f32 %v3166_v29, 0.0 }
 0x1ea   :  { %v1834_v36 = vmax.f32 %v3167_v37, 0.0  ;;  %v1745_v52 = vadd.f32 %v2919_v27, %v1584_v35  ;;  %v1856_v18 = vmax.f32 %v1742_v44, 0.0  ;;  %v1597_v37 = vadd.f32 %v3844_v50, %v3878_v48 }
 0x1eb   :  { %v1917_v57 = vpack.c.bf16 %v1833_v49, %v1830_v40 }
 0x1ec   :  { %v1918_v55 = vpack.c.bf16 %v1834_v36, %v1831_v51  ;;  %v1371_v56 = vpop.f32.mrb[16].mxu0  ;;  %v1859_v59 = vmax.f32 %v1745_v52, 0.0  ;;  %v2920_v62 = vpop.f32.mrb[96].mxu1  ;;  %v1600_v51 = vadd.f32 %v3846_v54, %v3878_v48 }
 0x1ed   :  { %v3168_v60 = vadd.f32 %v1371_v56, %v3898_v14  ;;  %v1373_v39 = vpop.f32.mrb[17].mxu0  ;;  %v2921_v63 = vpop.f32.mrb[97].mxu1 }
 0x1ee   :  { %v3169_v0 = vadd.f32 %v1373_v39, %v3900_v15  ;;  %v1375_v2 = vpop.f32.mrb[18].mxu0  ;;  %2211 = vmatprep.mubr.bf16.mxu1 %v1918_v55  ;;  %v2922_v21 = vadd.f32 %v2921_v63, %v2920_v62  ;;  %v2923_v7 = vpop.f32.mrb[98].mxu1  ;;  %v1931_v30 = vpack.c.bf16 %v1859_v59, %v1856_v18 }
 0x1ef   :  { %v3170_v6 = vadd.f32 %v1375_v2, %v3898_v14  ;;  %v1377_v4 = vpop.f32.mrb[19].mxu0  ;;  %2212 = vmatmul.mubr.bf16.gmra.mrb[140].mxu1 %v1917_v57  ;;  %v2924_v17 = vpop.f32.mrb[99].mxu1  ;;  %v1836_v43 = vmax.f32 %v3168_v60, 0.0 }
 0x1f0   :  { %v3171_v11 = vadd.f32 %v1377_v4, %v3900_v15  ;;  %v1750_v32 = vadd.f32 %v2922_v21, %v1589_v3  ;;  %v2925_v9 = vadd.f32 %v2924_v17, %v2923_v7  ;;  %3133 = vmatmul.mubr.bf16.gmra.mrb[76].mxu0 %v1931_v30  ;;  %v1837_v22 = vmax.f32 %v3169_v0, 0.0 }
 0x1f1   :  { %v1839_v19 = vmax.f32 %v3170_v6, 0.0  ;;  %v1605_v30 = vadd.f32 %v3848_v58, %v3878_v48 }
 0x1f2   :  { %v1840_v42 = vmax.f32 %v3171_v11, 0.0  ;;  %v1753_v23 = vadd.f32 %v2925_v9, %v1592_v10  ;;  %v1862_v28 = vmax.f32 %v1750_v32, 0.0 }
 0x1f3   :  { %v1920_v33 = vpack.c.bf16 %v1839_v19, %v1836_v43  ;;  %v1608_v19 = vadd.f32 %v3850_v61, %v3878_v48 }
 0x1f4   :  { %v1921_v47 = vpack.c.bf16 %v1840_v42, %v1837_v22  ;;  %v1381_v25 = vpop.f32.mrb[20].mxu0  ;;  %v1865_v12 = vmax.f32 %v1753_v23, 0.0  ;;  %v2926_v24 = vpop.f32.mrb[100].mxu1 }
 0x1f5   :  { %v3172_v29 = vadd.f32 %v1381_v25, %v3898_v14  ;;  %v1383_v46 = vpop.f32.mrb[21].mxu0  ;;  %v2927_v41 = vpop.f32.mrb[101].mxu1 }
 0x1f6   :  { %v3173_v34 = vadd.f32 %v1383_v46, %v3900_v15  ;;  %v1385_v35 = vpop.f32.mrb[22].mxu0  ;;  %2219 = vmatprep.mubr.bf16.mxu1 %v1921_v47  ;;  %v2928_v53 = vadd.f32 %v2927_v41, %v2926_v24  ;;  %v2929_v44 = vpop.f32.mrb[102].mxu1  ;;  %v1934_v27 = vpack.c.bf16 %v1865_v12, %v1862_v28 }
 0x1f7   :  { %v3174_v40 = vadd.f32 %v1385_v35, %v3898_v14  ;;  %v1387_v49 = vpop.f32.mrb[23].mxu0  ;;  %2220 = vmatmul.mubr.bf16.gmra.mrb[144].mxu1 %v1920_v33  ;;  %v2930_v57 = vpop.f32.mrb[103].mxu1  ;;  %v1842_v52 = vmax.f32 %v3172_v29, 0.0 }
 0x1f8   :  { %v3175_v36 = vadd.f32 %v1387_v49, %v3900_v15  ;;  %v1758_v55 = vadd.f32 %v2928_v53, %v1597_v37  ;;  %v2931_v18 = vadd.f32 %v2930_v57, %v2929_v44  ;;  %3136 = vmatprep.mubr.bf16.mxu0 %v1934_v27  ;;  %v1843_v59 = vmax.f32 %v3173_v34, 0.0 }
 0x1f9   :  { %v1845_v56 = vmax.f32 %v3174_v40, 0.0  ;;  %v1613_v44 = vadd.f32 %v3852_v1, %v3878_v48 }
 0x1fa   :  { %v1846_v50 = vmax.f32 %v3175_v36, 0.0  ;;  %v1761_v62 = vadd.f32 %v2931_v18, %v1600_v51  ;;  %v1868_v63 = vmax.f32 %v1758_v55, 0.0 }
 0x1fb   :  { %v1923_v60 = vpack.c.bf16 %v1845_v56, %v1842_v52  ;;  %v1616_v52 = vadd.f32 %v3854_v5, %v3878_v48 }
 0x1fc   :  { %v1924_v39 = vpack.c.bf16 %v1846_v50, %v1843_v59  ;;  %v1391_v0 = vpop.f32.mrb[24].mxu0  ;;  %v1871_v2 = vmax.f32 %v1761_v62, 0.0  ;;  %v2932_v21 = vpop.f32.mrb[104].mxu1 }
 0x1fd   :  { %v3176_v3 = vadd.f32 %v1391_v0, %v3898_v14  ;;  %v1393_v54 = vpop.f32.mrb[25].mxu0  ;;  %v2933_v7 = vpop.f32.mrb[105].mxu1 }
 0x1fe   :  { %v3177_v6 = vadd.f32 %v1393_v54, %v3900_v15  ;;  %v1395_v4 = vpop.f32.mrb[26].mxu0  ;;  %2227 = vmatprep.mubr.bf16.mxu1 %v1924_v39  ;;  %v2934_v10 = vadd.f32 %v2933_v7, %v2932_v21  ;;  %v2935_v17 = vpop.f32.mrb[106].mxu1  ;;  %v1937_v32 = vpack.c.bf16 %v1871_v2, %v1868_v63 }
 0x1ff   :  { %v3178_v11 = vadd.f32 %v1395_v4, %v3898_v14  ;;  %v1397_v43 = vpop.f32.mrb[27].mxu0  ;;  %2228 = vmatmul.mubr.bf16.gmra.mrb[148].mxu1 %v1923_v60  ;;  %v2936_v22 = vpop.f32.mrb[107].mxu1  ;;  %v1848_v42 = vmax.f32 %v3176_v3, 0.0 }
 0x200   :  { %v3179_v9 = vadd.f32 %v1397_v43, %v3900_v15  ;;  %v1766_v33 = vadd.f32 %v2934_v10, %v1605_v30  ;;  %v2937_v47 = vadd.f32 %v2936_v22, %v2935_v17  ;;  %3137 = vmatmul.mubr.bf16.gmra.mrb[80].mxu0 %v1937_v32  ;;  %v1849_v25 = vmax.f32 %v3177_v6, 0.0 }
 0x201   :  { %v1851_v23 = vmax.f32 %v3178_v11, 0.0  ;;  %v1621_v10 = vadd.f32 %v3856_v8, %v3878_v48 }
 0x202   :  { %v1852_v58 = vmax.f32 %v3179_v9, 0.0  ;;  %v1769_v12 = vadd.f32 %v2937_v47, %v1608_v19  ;;  %v1874_v46 = vmax.f32 %v1766_v33, 0.0  ;;  %v1624_v9 = vadd.f32 %v3858_v13, %v3878_v48 }
 0x203   :  { %v1926_v28 = vpack.c.bf16 %v1851_v23, %v1848_v42 }
 0x204   :  { %v1927_v29 = vpack.c.bf16 %v1852_v58, %v1849_v25  ;;  %v1401_v24 = vpop.f32.mrb[28].mxu0  ;;  %v1877_v34 = vmax.f32 %v1769_v12, 0.0  ;;  %v2938_v35 = vpop.f32.mrb[108].mxu1 }
 0x205   :  { %v3180_v41 = vadd.f32 %v1401_v24, %v3898_v14  ;;  %v1403_v61 = vpop.f32.mrb[29].mxu0  ;;  %v2939_v53 = vpop.f32.mrb[109].mxu1 }
 0x206   :  { %v3181_v37 = vadd.f32 %v1403_v61, %v3900_v15  ;;  %v1405_v40 = vpop.f32.mrb[30].mxu0  ;;  %2235 = vmatprep.mubr.bf16.mxu1 %v1927_v29  ;;  %v2940_v49 = vadd.f32 %v2939_v53, %v2938_v35  ;;  %v2941_v51 = vpop.f32.mrb[110].mxu1  ;;  %v1940_v57 = vpack.c.bf16 %v1877_v34, %v1874_v46 }
 0x207   :  { %v3182_v27 = vadd.f32 %v1405_v40, %v3898_v14  ;;  %v1407_v36 = vpop.f32.mrb[31].mxu0  ;;  %2236 = vmatmul.mubr.bf16.gmra.mrb[152].mxu1 %v1926_v28  ;;  %v2942_v56 = vpop.f32.mrb[111].mxu1  ;;  %v1854_v18 = vmax.f32 %v3180_v41, 0.0  ;;  %v1629_v40 = vadd.f32 %v3860_v16, %v3878_v48 }
 0x208   :  { %v3183_v55 = vadd.f32 %v1407_v36, %v3900_v15  ;;  %v1774_v59 = vadd.f32 %v2940_v49, %v1613_v44  ;;  %v2943_v60 = vadd.f32 %v2942_v56, %v2941_v51  ;;  %3140 = vmatprep.mubr.bf16.mxu0 %v1940_v57  ;;  %v1855_v62 = vmax.f32 %v3181_v37, 0.0 }
 0x209   :  { %v1857_v50 = vmax.f32 %v3182_v27, 0.0  ;;  %v1632_v57 = vadd.f32 %v3862_v20, %v3878_v48 }
 0x20a   :  { %v1858_v1 = vmax.f32 %v3183_v55, 0.0  ;;  %v1777_v0 = vadd.f32 %v2943_v60, %v1616_v52  ;;  %v1880_v3 = vmax.f32 %v1774_v59, 0.0 }
 0x20b   :  { %v1929_v39 = vpack.c.bf16 %v1857_v50, %v1854_v18 }
 0x20c   :  { %v1930_v63 = vpack.c.bf16 %v1858_v1, %v1855_v62  ;;  %v1411_v2 = vpop.f32.mrb[32].mxu0  ;;  %v1883_v21 = vmax.f32 %v1777_v0, 0.0  ;;  %v2944_v6 = vpop.f32.mrb[112].mxu1 }
 0x20d   :  { %v3184_v54 = vadd.f32 %v1411_v2, %v3898_v14  ;;  %v1413_v5 = vpop.f32.mrb[33].mxu0  ;;  %v2945_v4 = vpop.f32.mrb[113].mxu1 }
 0x20e   :  { %v3185_v7 = vadd.f32 %v1413_v5, %v3900_v15  ;;  %v1415_v30 = vpop.f32.mrb[34].mxu0  ;;  %2243 = vmatprep.mubr.bf16.mxu1 %v1930_v63  ;;  %v2946_v11 = vadd.f32 %v2945_v4, %v2944_v6  ;;  %v2947_v43 = vpop.f32.mrb[114].mxu1  ;;  %v1943_v19 = vpack.c.bf16 %v1883_v21, %v1880_v3 }
 0x20f   :  { %v3186_v17 = vadd.f32 %v1415_v30, %v3898_v14  ;;  %v1417_v32 = vpop.f32.mrb[35].mxu0  ;;  %2244 = vmatmul.mubr.bf16.gmra.mrb[156].mxu1 %v1929_v39  ;;  %v2948_v42 = vpop.f32.mrb[115].mxu1  ;;  %v1860_v33 = vmax.f32 %v3184_v54, 0.0 }
 0x210   :  { %v3187_v22 = vadd.f32 %v1417_v32, %v3900_v15  ;;  %v1782_v23 = vadd.f32 %v2946_v11, %v1621_v10  ;;  %v2949_v25 = vadd.f32 %v2948_v42, %v2947_v43  ;;  %3141 = vmatmul.mubr.bf16.gmra.mrb[84].mxu0 %v1943_v19  ;;  %v1861_v58 = vmax.f32 %v3185_v7, 0.0 }
 0x211   :  { %v1863_v47 = vmax.f32 %v3186_v17, 0.0  ;;  %v1637_v7 = vadd.f32 %v3864_v26, %v3878_v48  ;;  %v1640_v43 = vadd.f32 %v3866_v31, %v3878_v48 }
 0x212   :  { %v1864_v8 = vmax.f32 %v3187_v22, 0.0  ;;  %v1785_v12 = vadd.f32 %v2949_v25, %v1624_v9  ;;  %v1886_v46 = vmax.f32 %v1782_v23, 0.0 }
 0x213   :  { %v1932_v28 = vpack.c.bf16 %v1863_v47, %v1860_v33 }
 0x214   :  { %v1933_v29 = vpack.c.bf16 %v1864_v8, %v1861_v58  ;;  %v1421_v24 = vpop.f32.mrb[36].mxu0  ;;  %v1889_v34 = vmax.f32 %v1785_v12, 0.0  ;;  %v2950_v35 = vpop.f32.mrb[116].mxu1 }
 0x215   :  { %v3188_v41 = vadd.f32 %v1421_v24, %v3898_v14  ;;  %v1423_v13 = vpop.f32.mrb[37].mxu0  ;;  %v2951_v37 = vpop.f32.mrb[117].mxu1 }
 0x216   :  { %v3189_v61 = vadd.f32 %v1423_v13, %v3900_v15  ;;  %v1425_v53 = vpop.f32.mrb[38].mxu0  ;;  %2251 = vmatprep.mubr.bf16.mxu1 %v1933_v29  ;;  %v2952_v44 = vadd.f32 %v2951_v37, %v2950_v35  ;;  %v2953_v27 = vpop.f32.mrb[118].mxu1  ;;  %v1946_v36 = vpack.c.bf16 %v1889_v34, %v1886_v46  ;;  %v1645_v35 = vadd.f32 %v3871_v38, %v3878_v48 }
 0x217   :  { %v3190_v49 = vadd.f32 %v1425_v53, %v3898_v14  ;;  %v1427_v51 = vpop.f32.mrb[39].mxu0  ;;  %2252 = vmatmul.mubr.bf16.gmra.mrb[160].mxu1 %v1932_v28  ;;  %v2954_v55 = vpop.f32.mrb[119].mxu1  ;;  %v1866_v56 = vmax.f32 %v3188_v41, 0.0 }
 0x218   :  { %v3191_v52 = vadd.f32 %v1427_v51, %v3900_v15  ;;  %v1790_v18 = vadd.f32 %v2952_v44, %v1629_v40  ;;  %v2955_v50 = vadd.f32 %v2954_v55, %v2953_v27  ;;  %3144 = vmatprep.mubr.bf16.mxu0 %v1946_v36  ;;  %v1867_v60 = vmax.f32 %v3189_v61, 0.0 }
 0x219   :  { %v1869_v59 = vmax.f32 %v3190_v49, 0.0  ;;  %v1648_v44 = vadd.f32 %v3876_v45, %v3878_v48 }
 0x21a   :  { %v1870_v16 = vmax.f32 %v3191_v52, 0.0  ;;  %v1793_v1 = vadd.f32 %v2955_v50, %v1632_v57  ;;  %v1892_v63 = vmax.f32 %v1790_v18, 0.0 }
 0x21b   :  { %v1935_v62 = vpack.c.bf16 %v1869_v59, %v1866_v56 }
 0x21c   :  { %v1936_v39 = vpack.c.bf16 %v1870_v16, %v1867_v60  ;;  %v1431_v0 = vpop.f32.mrb[40].mxu0  ;;  %v1895_v2 = vmax.f32 %v1793_v1, 0.0  ;;  %v2956_v21 = vpop.f32.mrb[120].mxu1 }
 0x21d   :  { %v3192_v3 = vadd.f32 %v1431_v0, %v3898_v14  ;;  %v1433_v20 = vpop.f32.mrb[41].mxu0  ;;  %v2957_v6 = vpop.f32.mrb[121].mxu1 }
 0x21e   :  { %v3193_v54 = vadd.f32 %v1433_v20, %v3900_v15  ;;  %v1435_v5 = vpop.f32.mrb[42].mxu0  ;;  %2259 = vmatprep.mubr.bf16.mxu1 %v1936_v39  ;;  %v2958_v4 = vadd.f32 %v2957_v6, %v2956_v21  ;;  %v2959_v10 = vpop.f32.mrb[122].mxu1  ;;  %v1949_v17 = vpack.c.bf16 %v1895_v2, %v1892_v63 }
 0x21f   :  { %v3194_v30 = vadd.f32 %v1435_v5, %v3898_v14  ;;  %v1437_v11 = vpop.f32.mrb[43].mxu0  ;;  %2260 = vmatmul.mubr.bf16.gmra.mrb[164].mxu1 %v1935_v62  ;;  %v2960_v19 = vpop.f32.mrb[123].mxu1  ;;  %v1872_v9 = vmax.f32 %v3192_v3, 0.0 }
 0x220   :  { %v3195_v32 = vadd.f32 %v1437_v11, %v3900_v15  ;;  %v1798_v22 = vadd.f32 %v2958_v4, %v1637_v7  ;;  %v2961_v33 = vadd.f32 %v2960_v19, %v2959_v10  ;;  %3145 = vmatmul.mubr.bf16.gmra.mrb[88].mxu0 %v1949_v17  ;;  %v1873_v23 = vmax.f32 %v3193_v54, 0.0 }
 0x221   :  { %v1875_v42 = vmax.f32 %v3194_v30, 0.0 }
 0x222   :  { %v1876_v26 = vmax.f32 %v3195_v32, 0.0  ;;  %v1801_v25 = vadd.f32 %v2961_v33, %v1640_v43  ;;  %v1898_v28 = vmax.f32 %v1798_v22, 0.0 }
 0x223   :  { %v1938_v47 = vpack.c.bf16 %v1875_v42, %v1872_v9 }
 0x224   :  { %v1939_v58 = vpack.c.bf16 %v1876_v26, %v1873_v23  ;;  %v1441_v8 = vpop.f32.mrb[44].mxu0  ;;  %v1901_v12 = vmax.f32 %v1801_v25, 0.0  ;;  %v2962_v24 = vpop.f32.mrb[124].mxu1 }
 0x225   :  { %v3196_v29 = vadd.f32 %v1441_v8, %v3898_v14  ;;  %v1443_v31 = vpop.f32.mrb[45].mxu0  ;;  %v2963_v34 = vpop.f32.mrb[125].mxu1 }
 0x226   :  { %v3197_v46 = vadd.f32 %v1443_v31, %v3900_v15  ;;  %v1445_v41 = vpop.f32.mrb[46].mxu0  ;;  %2267 = vmatprep.mubr.bf16.mxu1 %v1939_v58  ;;  %v2964_v13 = vadd.f32 %v2963_v34, %v2962_v24  ;;  %v2965_v37 = vpop.f32.mrb[126].mxu1  ;;  %v1952_v40 = vpack.c.bf16 %v1901_v12, %v1898_v28 }
 0x227   :  { %v3198_v61 = vadd.f32 %v1445_v41, %v3898_v14  ;;  %v1447_v53 = vpop.f32.mrb[47].mxu0  ;;  %2268 = vmatmul.mubr.bf16.gmra.mrb[168].mxu1 %v1938_v47  ;;  %v2966_v27 = vpop.f32.mrb[127].mxu1  ;;  %v1878_v51 = vmax.f32 %v3196_v29, 0.0 }
 0x228   :  { %v3199_v49 = vadd.f32 %v1447_v53, %v3900_v15  ;;  %v1806_v36 = vadd.f32 %v2964_v13, %v1645_v35  ;;  %v2967_v52 = vadd.f32 %v2966_v27, %v2965_v37  ;;  %3148 = vmatprep.mubr.bf16.mxu0 %v1952_v40  ;;  %v1879_v55 = vmax.f32 %v3197_v46, 0.0 }
 0x229   :  { %v1881_v57 = vmax.f32 %v3198_v61, 0.0 }
 0x22a   :  { %v1882_v38 = vmax.f32 %v3199_v49, 0.0  ;;  %v1809_v18 = vadd.f32 %v2967_v52, %v1648_v44  ;;  %v1904_v60 = vmax.f32 %v1806_v36, 0.0 }
 0x22b   :  { %v1941_v56 = vpack.c.bf16 %v1881_v57, %v1878_v51 }
 0x22c   :  { %v1942_v59 = vpack.c.bf16 %v1882_v38, %v1879_v55  ;;  %v1451_v50 = vpop.f32.mrb[48].mxu0  ;;  %v1907_v16 = vmax.f32 %v1809_v18, 0.0 }
 0x22d   :  { %v3200_v62 = vadd.f32 %v1451_v50, %v3898_v14  ;;  %v1453_v1 = vpop.f32.mrb[49].mxu0 }
 0x22e   :  { %v3201_v45 = vadd.f32 %v1453_v1, %v3900_v15  ;;  %v1455_v48 = vpop.f32.mrb[50].mxu0  ;;  %2275 = vmatprep.mubr.bf16.mxu1 %v1942_v59  ;;  %v1955_v63 = vpack.c.bf16 %v1907_v16, %v1904_v60 }
 0x22f   :  { %v3202_v39 = vadd.f32 %v1455_v48, %v3898_v14  ;;  %v1457_v0 = vpop.f32.mrb[51].mxu0  ;;  %2276 = vmatmul.mubr.bf16.gmra.mrb[172].mxu1 %v1941_v56  ;;  %v1884_v3 = vmax.f32 %v3200_v62, 0.0 }
 0x230   :  { %v3203_v2 = vadd.f32 %v1457_v0, %v3900_v15  ;;  %3149 = vmatmul.mubr.bf16.gmra.mrb[92].mxu0 %v1955_v63  ;;  %v1885_v20 = vmax.f32 %v3201_v45, 0.0 }
 0x231   :  { %v1887_v21 = vmax.f32 %v3202_v39, 0.0 }
 0x232   :  { %v1888_v54 = vmax.f32 %v3203_v2, 0.0 }
 0x233   :  { %v1944_v6 = vpack.c.bf16 %v1887_v21, %v1884_v3 }
 0x234   :  { %v1945_v5 = vpack.c.bf16 %v1888_v54, %v1885_v20  ;;  %v1461_v7 = vpop.f32.mrb[52].mxu0 }
 0x235   :  { %v3204_v4 = vadd.f32 %v1461_v7, %v3898_v14  ;;  %v1463_v30 = vpop.f32.mrb[53].mxu0 }
 0x236   :  { %v3205_v10 = vadd.f32 %v1463_v30, %v3900_v15  ;;  %v1465_v11 = vpop.f32.mrb[54].mxu0  ;;  %2283 = vmatprep.mubr.bf16.mxu1 %v1945_v5 }
 0x237   :  { %v3206_v17 = vadd.f32 %v1465_v11, %v3898_v14  ;;  %v1467_v43 = vpop.f32.mrb[55].mxu0  ;;  %2284 = vmatmul.mubr.bf16.gmra.mrb[176].mxu1 %v1944_v6  ;;  %v1890_v19 = vmax.f32 %v3204_v4, 0.0 }
 0x238   :  { %v3207_v32 = vadd.f32 %v1467_v43, %v3900_v15  ;;  %v1891_v22 = vmax.f32 %v3205_v10, 0.0 }
 0x239   :  { %v1893_v9 = vmax.f32 %v3206_v17, 0.0 }
 0x23a   :  { %v1894_v42 = vmax.f32 %v3207_v32, 0.0 }
 0x23b   :  { %v1947_v33 = vpack.c.bf16 %v1893_v9, %v1890_v19 }
 0x23c   :  { %v1948_v23 = vpack.c.bf16 %v1894_v42, %v1891_v22  ;;  %v1471_v26 = vpop.f32.mrb[56].mxu0 }
 0x23d   :  { %v3208_v47 = vadd.f32 %v1471_v26, %v3898_v14  ;;  %v1473_v25 = vpop.f32.mrb[57].mxu0 }
 0x23e   :  { %v3209_v58 = vadd.f32 %v1473_v25, %v3900_v15  ;;  %v1475_v8 = vpop.f32.mrb[58].mxu0  ;;  %2291 = vmatprep.mubr.bf16.mxu1 %v1948_v23 }
 0x23f   :  { %v3210_v28 = vadd.f32 %v1475_v8, %v3898_v14  ;;  %v1477_v12 = vpop.f32.mrb[59].mxu0  ;;  %2292 = vmatmul.mubr.bf16.gmra.mrb[180].mxu1 %v1947_v33  ;;  %v1896_v24 = vmax.f32 %v3208_v47, 0.0 }
 0x240   :  { %v3211_v29 = vadd.f32 %v1477_v12, %v3900_v15  ;;  %v1897_v46 = vmax.f32 %v3209_v58, 0.0 }
 0x241   :  { %v1899_v31 = vmax.f32 %v3210_v28, 0.0 }
 0x242   :  { %v1900_v34 = vmax.f32 %v3211_v29, 0.0 }
 0x243   :  { %v1950_v41 = vpack.c.bf16 %v1899_v31, %v1896_v24 }
 0x244   :  { %v1951_v35 = vpack.c.bf16 %v1900_v34, %v1897_v46  ;;  %v1481_v13 = vpop.f32.mrb[60].mxu0 }
 0x245   :  { %v3212_v61 = vadd.f32 %v1481_v13, %v3898_v14  ;;  %v1483_v37 = vpop.f32.mrb[61].mxu0 }
 0x246   :  { %v3213_v53 = vadd.f32 %v1483_v37, %v3900_v15  ;;  %v1485_v40 = vpop.f32.mrb[62].mxu0  ;;  %2299 = vmatprep.mubr.bf16.mxu1 %v1951_v35 }
 0x247   :  { %v3214_v44 = vadd.f32 %v1485_v40, %v3898_v14  ;;  %v1487_v49 = vpop.f32.mrb[63].mxu0  ;;  %2300 = vmatmul.mubr.bf16.gmra.mrb[184].mxu1 %v1950_v41  ;;  %v1902_v51 = vmax.f32 %v3212_v61, 0.0 }
 0x248   :  { %v3215_v27 = vadd.f32 %v1487_v49, %v3900_v15  ;;  %v1903_v57 = vmax.f32 %v3213_v53, 0.0  ;;  %v4019_v15 = vld [vmem:[%s4106_s4] ss:$0 sm:$0xff]  ;;  %s3643_s4 = smov [#allocation8]  }
 0x249   :  { %v1905_v36 = vmax.f32 %v3214_v44, 0.0  ;;  %s2546_s10 = sshll.u32 %s3643_s4, 4  ;;  %s2547_s10 = int_to_ptr.vmem [resolvable:$true] %s2546_s10 }
 0x24a   :  { %v1906_v52 = vmax.f32 %v3215_v27, 0.0  ;;  %s3606_s11 = scalar_lea.vmem %s2547_s10, 4096  ;;  %p3611_p11 = scmp.lt.s32.totalorder %s2547_s10, %s2547_s10 }
 0x24b   :  { %v1953_v55 = vpack.c.bf16 %v1905_v36, %v1902_v51  ;;  %p3607_p10 = scmp.ne.s32.totalorder %s2547_s10, %s3606_s11  ;;  %p3612_p12 = scmp.lt.s32.totalorder %s3606_s11, %s3606_s11 }
 0x24c   :  { %v1954_v38 = vpack.c.bf16 %v1906_v52, %v1903_v57 }
 0x24d   :  { %p3613_p13 = por %p3612_p12, %p3611_p11 }
 0x24e   :  { %2307 = vmatprep.mubr.bf16.mxu1 %v1954_v38 }
 0x24f   :  { %2308 = vmatmul.mubr.bf16.gmra.mrb[188].mxu1 %v1953_v55  ;;  %p3614_p0 = pnand %p3613_p13, %p3607_p10 }
 0x293   :  { %v3122_v56 = vpop.f32.mrb[64].mxu0 }
 0x294   :  { %v2350_v18 = vpop.f32.mrb[65].mxu0 }
 0x295   :  { %v3123_v59 = vpop.f32.mrb[66].mxu0 }
 0x296   :  { %v2353_v50 = vpop.f32.mrb[67].mxu0 }
 0x2a3   :  { %v3126_v60 = vpop.f32.mrb[68].mxu0 }
 0x2a4   :  { %v2366_v16 = vpop.f32.mrb[69].mxu0 }
 0x2a5   :  { %v4014_v62 = vpop.f32.mrb[70].mxu0 }
 0x2a6   :  { %v2369_v14 = vpop.f32.mrb[71].mxu0 }
 0x2aa   :  { %v2984_v1 = vpop.f32.mrb[128].mxu1 }
 0x2ab   :  { %v2985_v45 = vpop.f32.mrb[129].mxu1 }
 0x2ac   :  { %v2986_v48 = vadd.f32 %v2985_v45, %v2984_v1  ;;  %v2987_v39 = vpop.f32.mrb[130].mxu1 }
 0x2ad   :  { %v2988_v0 = vpop.f32.mrb[131].mxu1 }
 0x2ae   :  { %v2190_v63 = vadd.f32 %v2986_v48, %v4019_v15  ;;  %v2989_v2 = vadd.f32 %v2988_v0, %v2987_v39 }
 0x2b0   :  { %v2351_v3 = vadd.f32 %v2350_v18, %v2190_v63  ;;  %v2193_v21 = vadd.f32 %v2989_v2, %v4019_v15 }
 0x2b2   :  { %v2477_v20 = vmax.f32 %v2351_v3, 0.0  ;;  %v2354_v54 = vadd.f32 %v2353_v50, %v2193_v21  ;;  %v2990_v6 = vpop.f32.mrb[132].mxu1 }
 0x2b3   :  { %v2991_v5 = vpop.f32.mrb[133].mxu1  ;;  %v4023_v30 = vpop.f32.mrb[72].mxu0 }
 0x2b4   :  { %2509 = vst [vmem:[#allocation8] sm:$0xff] %v2477_v20  ;;  %v2478_v7 = vmax.f32 %v2354_v54, 0.0  ;;  %v2992_v4 = vadd.f32 %v2991_v5, %v2990_v6  ;;  %v2993_v10 = vpop.f32.mrb[134].mxu1  ;;  %v2382_v11 = vpop.f32.mrb[73].mxu0 }
 0x2b5   :  { %v2994_v17 = vpop.f32.mrb[135].mxu1  ;;  %v4026_v19 = vpop.f32.mrb[74].mxu0 }
 0x2b6   :  { %2510 = vst [vmem:[#allocation8 + $0x8] sm:$0xff] %v2478_v7  ;;  %v2198_v43 = vadd.f32 %v2992_v4, %v4019_v15  ;;  %v2995_v32 = vadd.f32 %v2994_v17, %v2993_v10  ;;  %v2385_v9 = vpop.f32.mrb[75].mxu0 }
 0x2b8   :  { %v2359_v22 = vadd.f32 %v3122_v56, %v2198_v43  ;;  %v2201_v42 = vadd.f32 %v2995_v32, %v4019_v15 }
 0x2ba   :  { %v2479_v33 = vmax.f32 %v2359_v22, 0.0  ;;  %v2362_v23 = vadd.f32 %v3123_v59, %v2201_v42  ;;  %v2996_v26 = vpop.f32.mrb[136].mxu1 }
 0x2bb   :  { %v2997_v47 = vpop.f32.mrb[137].mxu1 }
 0x2bc   :  { %2511 = vst [vmem:[#allocation8 + $0x10] sm:$0xff] %v2479_v33  ;;  %v2480_v25 = vmax.f32 %v2362_v23, 0.0  ;;  %v2998_v58 = vadd.f32 %v2997_v47, %v2996_v26  ;;  %v2999_v8 = vpop.f32.mrb[138].mxu1 }
 0x2bd   :  { %v3000_v28 = vpop.f32.mrb[139].mxu1 }
 0x2be   :  { %2512 = vst [vmem:[#allocation8 + $0x18] sm:$0xff] %v2480_v25  ;;  %v2206_v12 = vadd.f32 %v2998_v58, %v4019_v15  ;;  %v3001_v29 = vadd.f32 %v3000_v28, %v2999_v8 }
 0x2c0   :  { %v2367_v24 = vadd.f32 %v2366_v16, %v2206_v12  ;;  %v2209_v31 = vadd.f32 %v3001_v29, %v4019_v15 }
 0x2c2   :  { %v2481_v46 = vmax.f32 %v2367_v24, 0.0  ;;  %v2370_v34 = vadd.f32 %v2369_v14, %v2209_v31  ;;  %v3002_v41 = vpop.f32.mrb[140].mxu1 }
 0x2c3   :  { %v3003_v35 = vpop.f32.mrb[141].mxu1  ;;  %v4031_v37 = vpop.f32.mrb[76].mxu0 }
 0x2c4   :  { %2513 = vst [vmem:[#allocation8 + $0x20] sm:$0xff] %v2481_v46  ;;  %v2482_v13 = vmax.f32 %v2370_v34, 0.0  ;;  %v3004_v61 = vadd.f32 %v3003_v35, %v3002_v41  ;;  %v3005_v53 = vpop.f32.mrb[142].mxu1  ;;  %v2398_v40 = vpop.f32.mrb[77].mxu0 }
 0x2c5   :  { %v3006_v44 = vpop.f32.mrb[143].mxu1  ;;  %v4034_v51 = vpop.f32.mrb[78].mxu0 }
 0x2c6   :  { %2514 = vst [vmem:[#allocation8 + $0x28] sm:$0xff] %v2482_v13  ;;  %v2214_v49 = vadd.f32 %v3004_v61, %v4019_v15  ;;  %v3007_v27 = vadd.f32 %v3006_v44, %v3005_v53  ;;  %v2401_v36 = vpop.f32.mrb[79].mxu0 }
 0x2c8   :  { %v2375_v57 = vadd.f32 %v3126_v60, %v2214_v49  ;;  %v2217_v52 = vadd.f32 %v3007_v27, %v4019_v15 }
 0x2ca   :  { %v2483_v55 = vmax.f32 %v2375_v57, 0.0  ;;  %v2378_v38 = vadd.f32 %v4014_v62, %v2217_v52  ;;  %v3008_v56 = vpop.f32.mrb[144].mxu1 }
 0x2cb   :  { %v3009_v18 = vpop.f32.mrb[145].mxu1 }
 0x2cc   :  { %2515 = vst [vmem:[#allocation8 + $0x30] sm:$0xff] %v2483_v55  ;;  %v2484_v59 = vmax.f32 %v2378_v38, 0.0  ;;  %v3010_v50 = vadd.f32 %v3009_v18, %v3008_v56  ;;  %v3011_v16 = vpop.f32.mrb[146].mxu1 }
 0x2cd   :  { %v3012_v14 = vpop.f32.mrb[147].mxu1 }
 0x2ce   :  { %2516 = vst [vmem:[#allocation8 + $0x38] sm:$0xff] %v2484_v59  ;;  %v2222_v1 = vadd.f32 %v3010_v50, %v4019_v15  ;;  %v3013_v45 = vadd.f32 %v3012_v14, %v3011_v16 }
 0x2d0   :  { %v2383_v48 = vadd.f32 %v2382_v11, %v2222_v1  ;;  %v2225_v39 = vadd.f32 %v3013_v45, %v4019_v15 }
 0x2d2   :  { %v2485_v60 = vmax.f32 %v2383_v48, 0.0  ;;  %v2386_v0 = vadd.f32 %v2385_v9, %v2225_v39  ;;  %v3014_v63 = vpop.f32.mrb[148].mxu1 }
 0x2d3   :  { %v3015_v2 = vpop.f32.mrb[149].mxu1  ;;  %v4040_v21 = vpop.f32.mrb[80].mxu0 }
 0x2d4   :  { %2517 = vst [vmem:[#allocation8 + $0x40] sm:$0xff] %v2485_v60  ;;  %v2486_v62 = vmax.f32 %v2386_v0, 0.0  ;;  %v3016_v3 = vadd.f32 %v3015_v2, %v3014_v63  ;;  %v3017_v20 = vpop.f32.mrb[150].mxu1  ;;  %v2414_v54 = vpop.f32.mrb[81].mxu0 }
 0x2d5   :  { %v3018_v6 = vpop.f32.mrb[151].mxu1  ;;  %v4043_v4 = vpop.f32.mrb[82].mxu0 }
 0x2d6   :  { %2518 = vst [vmem:[#allocation8 + $0x48] sm:$0xff] %v2486_v62  ;;  %v2230_v5 = vadd.f32 %v3016_v3, %v4019_v15  ;;  %v3019_v7 = vadd.f32 %v3018_v6, %v3017_v20  ;;  %v2417_v10 = vpop.f32.mrb[83].mxu0 }
 0x2d8   :  { %v2391_v11 = vadd.f32 %v4023_v30, %v2230_v5  ;;  %v2233_v17 = vadd.f32 %v3019_v7, %v4019_v15 }
 0x2da   :  { %v2487_v43 = vmax.f32 %v2391_v11, 0.0  ;;  %v2394_v32 = vadd.f32 %v4026_v19, %v2233_v17  ;;  %v3020_v9 = vpop.f32.mrb[152].mxu1 }
 0x2db   :  { %v3021_v22 = vpop.f32.mrb[153].mxu1 }
 0x2dc   :  { %2519 = vst [vmem:[#allocation8 + $0x50] sm:$0xff] %v2487_v43  ;;  %v2488_v42 = vmax.f32 %v2394_v32, 0.0  ;;  %v3022_v33 = vadd.f32 %v3021_v22, %v3020_v9  ;;  %v3023_v23 = vpop.f32.mrb[154].mxu1 }
 0x2dd   :  { %v3024_v26 = vpop.f32.mrb[155].mxu1 }
 0x2de   :  { %2520 = vst [vmem:[#allocation8 + $0x58] sm:$0xff] %v2488_v42  ;;  %v2238_v47 = vadd.f32 %v3022_v33, %v4019_v15  ;;  %v3025_v25 = vadd.f32 %v3024_v26, %v3023_v23 }
 0x2e0   :  { %v2399_v58 = vadd.f32 %v2398_v40, %v2238_v47  ;;  %v2241_v8 = vadd.f32 %v3025_v25, %v4019_v15 }
 0x2e2   :  { %v2489_v30 = vmax.f32 %v2399_v58, 0.0  ;;  %v2402_v28 = vadd.f32 %v2401_v36, %v2241_v8  ;;  %v3026_v12 = vpop.f32.mrb[156].mxu1 }
 0x2e3   :  { %v3027_v29 = vpop.f32.mrb[157].mxu1  ;;  %v4050_v31 = vpop.f32.mrb[84].mxu0 }
 0x2e4   :  { %2521 = vst [vmem:[#allocation8 + $0x60] sm:$0xff] %v2489_v30  ;;  %v2490_v19 = vmax.f32 %v2402_v28, 0.0  ;;  %v3028_v24 = vadd.f32 %v3027_v29, %v3026_v12  ;;  %v3029_v46 = vpop.f32.mrb[158].mxu1  ;;  %v2430_v34 = vpop.f32.mrb[85].mxu0 }
 0x2e5   :  { %v3030_v41 = vpop.f32.mrb[159].mxu1  ;;  %v4053_v61 = vpop.f32.mrb[86].mxu0 }
 0x2e6   :  { %2522 = vst [vmem:[#allocation8 + $0x68] sm:$0xff] %v2490_v19  ;;  %v2246_v35 = vadd.f32 %v3028_v24, %v4019_v15  ;;  %v3031_v13 = vadd.f32 %v3030_v41, %v3029_v46  ;;  %v2433_v53 = vpop.f32.mrb[87].mxu0 }
 0x2e8   :  { %v2407_v40 = vadd.f32 %v4031_v37, %v2246_v35  ;;  %v2249_v44 = vadd.f32 %v3031_v13, %v4019_v15 }
 0x2ea   :  { %v2491_v49 = vmax.f32 %v2407_v40, 0.0  ;;  %v2410_v27 = vadd.f32 %v4034_v51, %v2249_v44  ;;  %v3032_v36 = vpop.f32.mrb[160].mxu1 }
 0x2eb   :  { %v3033_v57 = vpop.f32.mrb[161].mxu1 }
 0x2ec   :  { %2523 = vst [vmem:[#allocation8 + $0x70] sm:$0xff] %v2491_v49  ;;  %v2492_v52 = vmax.f32 %v2410_v27, 0.0  ;;  %v3034_v55 = vadd.f32 %v3033_v57, %v3032_v36  ;;  %v3035_v38 = vpop.f32.mrb[162].mxu1 }
 0x2ed   :  { %v3036_v56 = vpop.f32.mrb[163].mxu1 }
 0x2ee   :  { %2524 = vst [vmem:[#allocation8 + $0x78] sm:$0xff] %v2492_v52  ;;  %v2254_v18 = vadd.f32 %v3034_v55, %v4019_v15  ;;  %v3037_v59 = vadd.f32 %v3036_v56, %v3035_v38 }
 0x2f0   :  { %v2415_v50 = vadd.f32 %v2414_v54, %v2254_v18  ;;  %v2257_v16 = vadd.f32 %v3037_v59, %v4019_v15 }
 0x2f2   :  { %v2493_v37 = vmax.f32 %v2415_v50, 0.0  ;;  %v2418_v14 = vadd.f32 %v2417_v10, %v2257_v16  ;;  %v3038_v1 = vpop.f32.mrb[164].mxu1 }
 0x2f3   :  { %v3039_v45 = vpop.f32.mrb[165].mxu1  ;;  %v4060_v39 = vpop.f32.mrb[88].mxu0 }
 0x2f4   :  { %2525 = vst [vmem:[#allocation8 + $0x80] sm:$0xff] %v2493_v37  ;;  %v2494_v51 = vmax.f32 %v2418_v14, 0.0  ;;  %v3040_v48 = vadd.f32 %v3039_v45, %v3038_v1  ;;  %v3041_v60 = vpop.f32.mrb[166].mxu1  ;;  %v2446_v0 = vpop.f32.mrb[89].mxu0 }
 0x2f5   :  { %v3042_v63 = vpop.f32.mrb[167].mxu1  ;;  %v4063_v3 = vpop.f32.mrb[90].mxu0 }
 0x2f6   :  { %2526 = vst [vmem:[#allocation8 + $0x88] sm:$0xff] %v2494_v51  ;;  %v2262_v2 = vadd.f32 %v3040_v48, %v4019_v15  ;;  %v3043_v62 = vadd.f32 %v3042_v63, %v3041_v60  ;;  %v2449_v20 = vpop.f32.mrb[91].mxu0 }
 0x2f8   :  { %v2423_v54 = vadd.f32 %v4040_v21, %v2262_v2  ;;  %v2265_v6 = vadd.f32 %v3043_v62, %v4019_v15 }
 0x2fa   :  { %v2495_v5 = vmax.f32 %v2423_v54, 0.0  ;;  %v2426_v7 = vadd.f32 %v4043_v4, %v2265_v6  ;;  %v3044_v10 = vpop.f32.mrb[168].mxu1 }
 0x2fb   :  { %v3045_v11 = vpop.f32.mrb[169].mxu1 }
 0x2fc   :  { %2527 = vst [vmem:[#allocation8 + $0x90] sm:$0xff] %v2495_v5  ;;  %v2496_v17 = vmax.f32 %v2426_v7, 0.0  ;;  %v3046_v43 = vadd.f32 %v3045_v11, %v3044_v10  ;;  %v3047_v32 = vpop.f32.mrb[170].mxu1 }
 0x2fd   :  { %v3048_v9 = vpop.f32.mrb[171].mxu1 }
 0x2fe   :  { %2528 = vst [vmem:[#allocation8 + $0x98] sm:$0xff] %v2496_v17  ;;  %v2270_v22 = vadd.f32 %v3046_v43, %v4019_v15  ;;  %v3049_v42 = vadd.f32 %v3048_v9, %v3047_v32 }
 0x300   :  { %v2431_v33 = vadd.f32 %v2430_v34, %v2270_v22  ;;  %v2273_v23 = vadd.f32 %v3049_v42, %v4019_v15 }
 0x302   :  { %v2497_v21 = vmax.f32 %v2431_v33, 0.0  ;;  %v2434_v26 = vadd.f32 %v2433_v53, %v2273_v23  ;;  %v3050_v47 = vpop.f32.mrb[172].mxu1 }
 0x303   :  { %v3051_v25 = vpop.f32.mrb[173].mxu1  ;;  %v4070_v8 = vpop.f32.mrb[92].mxu0 }
 0x304   :  { %2529 = vst [vmem:[#allocation8 + $0xa0] sm:$0xff] %v2497_v21  ;;  %v2498_v4 = vmax.f32 %v2434_v26, 0.0  ;;  %v3052_v58 = vadd.f32 %v3051_v25, %v3050_v47  ;;  %v3053_v30 = vpop.f32.mrb[174].mxu1  ;;  %v2462_v28 = vpop.f32.mrb[93].mxu0 }
 0x305   :  { %v3054_v12 = vpop.f32.mrb[175].mxu1  ;;  %v4073_v24 = vpop.f32.mrb[94].mxu0 }
 0x306   :  { %2530 = vst [vmem:[#allocation8 + $0xa8] sm:$0xff] %v2498_v4  ;;  %v2278_v29 = vadd.f32 %v3052_v58, %v4019_v15  ;;  %v3055_v19 = vadd.f32 %v3054_v12, %v3053_v30  ;;  %v2465_v46 = vpop.f32.mrb[95].mxu0 }
 0x308   :  { %v2439_v34 = vadd.f32 %v4050_v31, %v2278_v29  ;;  %v2281_v41 = vadd.f32 %v3055_v19, %v4019_v15 }
 0x30a   :  { %v2499_v35 = vmax.f32 %v2439_v34, 0.0  ;;  %v2442_v13 = vadd.f32 %v4053_v61, %v2281_v41  ;;  %v3056_v53 = vpop.f32.mrb[176].mxu1 }
 0x30b   :  { %v3057_v40 = vpop.f32.mrb[177].mxu1 }
 0x30c   :  { %2531 = vst [vmem:[#allocation8 + $0xb0] sm:$0xff] %v2499_v35  ;;  %v2500_v44 = vmax.f32 %v2442_v13, 0.0  ;;  %v3058_v49 = vadd.f32 %v3057_v40, %v3056_v53  ;;  %v3059_v27 = vpop.f32.mrb[178].mxu1 }
 0x30d   :  { %v3060_v36 = vpop.f32.mrb[179].mxu1 }
 0x30e   :  { %2532 = vst [vmem:[#allocation8 + $0xb8] sm:$0xff] %v2500_v44  ;;  %v2286_v57 = vadd.f32 %v3058_v49, %v4019_v15  ;;  %v3061_v52 = vadd.f32 %v3060_v36, %v3059_v27 }
 0x310   :  { %v2447_v55 = vadd.f32 %v2446_v0, %v2286_v57  ;;  %v2289_v38 = vadd.f32 %v3061_v52, %v4019_v15 }
 0x312   :  { %v2501_v31 = vmax.f32 %v2447_v55, 0.0  ;;  %v2450_v56 = vadd.f32 %v2449_v20, %v2289_v38  ;;  %v3062_v18 = vpop.f32.mrb[180].mxu1 }
 0x313   :  { %v3063_v59 = vpop.f32.mrb[181].mxu1 }
 0x314   :  { %2533 = vst [vmem:[#allocation8 + $0xc0] sm:$0xff] %v2501_v31  ;;  %v2502_v61 = vmax.f32 %v2450_v56, 0.0  ;;  %v3064_v50 = vadd.f32 %v3063_v59, %v3062_v18  ;;  %v3065_v16 = vpop.f32.mrb[182].mxu1 }
 0x315   :  { %v3066_v37 = vpop.f32.mrb[183].mxu1 }
 0x316   :  { %2534 = vst [vmem:[#allocation8 + $0xc8] sm:$0xff] %v2502_v61  ;;  %v2294_v14 = vadd.f32 %v3064_v50, %v4019_v15  ;;  %v3067_v1 = vadd.f32 %v3066_v37, %v3065_v16 }
 0x318   :  { %v2455_v45 = vadd.f32 %v4060_v39, %v2294_v14  ;;  %v2297_v51 = vadd.f32 %v3067_v1, %v4019_v15 }
 0x31a   :  { %v2503_v48 = vmax.f32 %v2455_v45, 0.0  ;;  %v2458_v60 = vadd.f32 %v4063_v3, %v2297_v51  ;;  %v3068_v0 = vpop.f32.mrb[184].mxu1 }
 0x31b   :  { %v3069_v63 = vpop.f32.mrb[185].mxu1 }
 0x31c   :  { %2535 = vst [vmem:[#allocation8 + $0xd0] sm:$0xff] %v2503_v48  ;;  %v2504_v2 = vmax.f32 %v2458_v60, 0.0  ;;  %v3070_v62 = vadd.f32 %v3069_v63, %v3068_v0  ;;  %v3071_v20 = vpop.f32.mrb[186].mxu1 }
 0x31d   :  { %v3072_v54 = vpop.f32.mrb[187].mxu1 }
 0x31e   :  { %2536 = vst [vmem:[#allocation8 + $0xd8] sm:$0xff] %v2504_v2  ;;  %v2302_v6 = vadd.f32 %v3070_v62, %v4019_v15  ;;  %v3073_v5 = vadd.f32 %v3072_v54, %v3071_v20 }
 0x320   :  { %v2463_v7 = vadd.f32 %v2462_v28, %v2302_v6  ;;  %v2305_v10 = vadd.f32 %v3073_v5, %v4019_v15 }
 0x322   :  { %v2505_v39 = vmax.f32 %v2463_v7, 0.0  ;;  %v2466_v11 = vadd.f32 %v2465_v46, %v2305_v10  ;;  %v3074_v17 = vpop.f32.mrb[188].mxu1 }
 0x323   :  { %v3075_v43 = vpop.f32.mrb[189].mxu1 }
 0x324   :  { %2537 = vst [vmem:[#allocation8 + $0xe0] sm:$0xff] %v2505_v39  ;;  %v2506_v3 = vmax.f32 %v2466_v11, 0.0  ;;  %v3076_v32 = vadd.f32 %v3075_v43, %v3074_v17  ;;  %v3077_v9 = vpop.f32.mrb[190].mxu1 }
 0x325   :  { %v3078_v22 = vpop.f32.mrb[191].mxu1 }
 0x326   :  { %2538 = vst [vmem:[#allocation8 + $0xe8] sm:$0xff] %v2506_v3  ;;  %v2310_v42 = vadd.f32 %v3076_v32, %v4019_v15  ;;  %v3079_v33 = vadd.f32 %v3078_v22, %v3077_v9 }
 0x328   :  { %v2471_v23 = vadd.f32 %v4070_v8, %v2310_v42  ;;  %v2313_v21 = vadd.f32 %v3079_v33, %v4019_v15 }
 0x32a   :  { %v2507_v26 = vmax.f32 %v2471_v23, 0.0  ;;  %v2474_v47 = vadd.f32 %v4073_v24, %v2313_v21 }
 0x32c   :  { %2539 = vst [vmem:[#allocation8 + $0xf0] sm:$0xff] %v2507_v26  ;;  %v2508_v25 = vmax.f32 %v2474_v47, 0.0 }
 0x32e   :  { %2540 = vst [vmem:[#allocation8 + $0xf8] sm:$0xff] %v2508_v25 }
 0x32f   :  { %3617 = shalt.err (!%p3614_p0)
}
 0x330   :  { %s3618_s14 = scalar_lea.hbm %s4107_s5, 4096 }
 0x331   :  { %p3619_p1 = scmp.ne.s32.totalorder %s4107_s5, %s3618_s14  ;;  %p3622_p2 = scmp.lt.u32.totalorder %s3618_s14, %s4107_s5 }
 0x333   :  { %p3624_p3 = pnand %p3622_p2, %p3619_p1 }
 0x335   :  { %3627 = shalt.err (!%p3624_p3)
}
 0x336   :  { %s3644_s18 = smov 128   ;;  %s3645_s19 = smov 8  }
 0x337   :  { %2552 = dma.vmem_to_hbm [thread:$0]  %s2547_s10, 4096, %s4107_s5, [#allocation4], %s3644_s18, %s3644_s18, %s3645_s19  }
 0x338   :  { %3632 = dma.done.wait [#allocation4], 4096  }
 0x339   :  { %3633 = vsyncadd [#allocation4], 4294963200 }
 0x33a   :  { %2556 = vsyncpa [#allocation3], 1 }
 0x33b   :  { %2557 = vsyncpa [#allocation6], 1 }
 0x33c   :  { %2558 = vsyncpa [#allocation4], 1 }

</bundles_post_ra>
